<compile_context>
chip_gen: v6e
topology: v6e:2x2x1
jax: 0.10.0
libtpu: 0.0.40
codegen_flags: <defaults>
</compile_context>

<pallas_src>
import jax
import jax.numpy as jnp
from jax.experimental import pallas as pl
from jax.experimental.pallas import tpu as pltpu

KSIZE = 4       # kernel_size=4, stride=1, padding=0 (module defaults)
CPAD = 128      # all channel dims zero-padded to one full lane register
BN_EPS = 1e-5


def _shift_conv(x_bf16, w_ref, b_ref, l_out):
    """Valid 1-D conv (stride=1, pad=0), channels-last, as K accumulating
    (l_out,128)@(128,128) MXU matmuls over shifted length-slices.
      x_bf16: (L_in, 128) bf16;  w_ref: (K, 128, 128) bf16;  b_ref: (1, 128) f32
    """
    acc = jnp.dot(x_bf16[0:l_out, :], w_ref[0], preferred_element_type=jnp.float32)
    for k in range(1, KSIZE):
        acc = acc + jnp.dot(x_bf16[k:k + l_out, :], w_ref[k],
                            preferred_element_type=jnp.float32)
    return acc + b_ref[...]


# ---------------------------------------------------------------------------
# Kernel 1: encoder (Conv1d x3) + per-row BatchNorm partial statistics
# ---------------------------------------------------------------------------
def _encoder_kernel(x_ref, w1_ref, b1_ref, w2_ref, b2_ref, w3_ref, b3_ref,
                    h3_ref, stats_ref):
    L = x_ref.shape[1]
    x = x_ref[0].astype(jnp.bfloat16)                        # (L, 128)
    h1 = _shift_conv(x, w1_ref, b1_ref, L - 3)               # f32
    h2 = _shift_conv(h1.astype(jnp.bfloat16), w2_ref, b2_ref, L - 6)
    h3 = _shift_conv(h2.astype(jnp.bfloat16), w3_ref, b3_ref, L - 9)
    h3_ref[0] = h3
    # partial BatchNorm statistics for this batch row (reduced outside)
    s = jnp.sum(h3, axis=0, keepdims=True)                   # (1, 128)
    ss = jnp.sum(h3 * h3, axis=0, keepdims=True)             # (1, 128)
    stats_ref[0] = jnp.concatenate([s, ss], axis=0)          # (2, 128)


# ---------------------------------------------------------------------------
# Kernel 2: BN affine -> MaxPool1d -> MaxUnpool1d -> ConvTranspose1d x3
# ---------------------------------------------------------------------------
def _decoder_kernel(h3_ref, scale_ref, shift_ref,
                    wt1_ref, bt1_ref, wt2_ref, bt2_ref, wt3_ref, bt3_ref,
                    o_ref):
    K = KSIZE
    C = CPAD
    L3 = h3_ref.shape[1]

    # BatchNorm1d (full-batch statistics folded into scale/shift by the wrapper)
    h = h3_ref[0] * scale_ref[...] + shift_ref[...]          # (L3, 128) f32

    # MaxPool1d(K, stride=1, return_indices=True); strict '>' -> earliest index
    # wins on exact ties (measure-zero for float inputs vs. PyTorch backends).
    Lp = L3 - K + 1
    pos = jax.lax.broadcasted_iota(jnp.int32, (Lp, C), 0)
    best = h[0:Lp, :]
    bidx = pos
    for k in range(1, K):
        cand = h[k:k + Lp, :]
        take = cand > best
        bidx = jnp.where(take, pos + k, bidx)
        best = jnp.maximum(best, cand)

    # MaxUnpool1d as K passes over the relative argmax offset rel in [0, K):
    # output row j receives best[t] whenever bidx[t] == j (t = j - k, rel == k).
    # Colliding writers always carry the same value (h at the argmax), so pass
    # order does not matter.  O(K*L) selects instead of O(L^2).
    rel = bidx - pos
    u = jnp.zeros((L3, C), jnp.float32)
    for k in range(K):
        hit = jnp.where(rel == k, 1.0, 0.0)
        parts_v, parts_m = [best], [hit]
        if k > 0:
            parts_v.insert(0, jnp.zeros((k, C), jnp.float32))
            parts_m.insert(0, jnp.zeros((k, C), jnp.float32))
        tail = K - 1 - k
        if tail > 0:
            parts_v.append(jnp.zeros((tail, C), jnp.float32))
            parts_m.append(jnp.zeros((tail, C), jnp.float32))
        val = parts_v[0] if len(parts_v) == 1 else jnp.concatenate(parts_v, axis=0)
        msk = parts_m[0] if len(parts_m) == 1 else jnp.concatenate(parts_m, axis=0)
        u = jnp.where(msk > 0.5, val, u)

    # ConvTranspose1d (stride=1, pad=0) == valid conv of the zero-padded input
    # with the K-flipped kernel (flip folded into wt*_ref at prep time).
    def conv_t(xin, w_ref, b_ref):
        li = xin.shape[0]
        z = jnp.zeros((K - 1, C), jnp.float32)
        xpad = jnp.concatenate([z, xin, z], axis=0).astype(jnp.bfloat16)
        return _shift_conv(xpad, w_ref, b_ref, li + K - 1)

    d = conv_t(u, wt1_ref, bt1_ref)       # (L-6, 128)
    d = conv_t(d, wt2_ref, bt2_ref)       # (L-3, 128)
    d = conv_t(d, wt3_ref, bt3_ref)       # (L,   128)
    o_ref[0] = d                          # lane-dense store (128 lanes)


# ---------------------------------------------------------------------------
# Wrapper: one-time weight prep + two gridded pallas_calls
# ---------------------------------------------------------------------------
def _pad_lanes(v, target=CPAD):
    pad = target - v.shape[-1]
    if pad <= 0:
        return v
    return jnp.pad(v, [(0, 0)] * (v.ndim - 1) + [(0, pad)])


def prepare_fused_params(params, cpad=CPAD):
    """One-time prep (outside the hot path): channels-last weights padded to
    128 lanes, ConvTranspose kernel flip folded in, MXU operands cast to bf16."""
    def conv_w(w_k):                       # (K, C_in, C_out) -> (K, cpad, cpad) bf16
        k, ci, co = w_k.shape
        w = jnp.zeros((k, cpad, cpad), jnp.float32).at[:, :ci, :co].set(
            w_k.astype(jnp.float32))
        return w.astype(jnp.bfloat16)

    def convT_w(w_pt):                     # PyTorch ConvTranspose1d layout (C_in, C_out, K)
        w_k = jnp.transpose(w_pt, (2, 0, 1))[::-1]     # flip along K -> (K, C_in, C_out)
        return conv_w(w_k)

    def vec(v):
        return _pad_lanes(v.astype(jnp.float32).reshape(1, -1), cpad)

    return dict(
        w1=conv_w(params["w1"]), b1=vec(params["b1"]),
        w2=conv_w(params["w2"]), b2=vec(params["b2"]),
        w3=conv_w(params["w3"]), b3=vec(params["b3"]),
        gamma=vec(params["gamma"]), beta=vec(params["beta"]),
        wt1=convT_w(params["wt1"]), bt1=vec(params["bt1"]),
        wt2=convT_w(params["wt2"]), bt2=vec(params["bt2"]),
        wt3=convT_w(params["wt3"]), bt3=vec(params["bt3"]),
    )


@jax.jit
def audio_encoder_forward(x_ncl, fused):
    """x_ncl: (N, C_in, L) — PyTorch NCL convention; output has the same shape."""
    N, C_in, L = x_ncl.shape
    L3 = L - 3 * (KSIZE - 1)

    x = _pad_lanes(jnp.transpose(x_ncl, (0, 2, 1)).astype(jnp.float32))   # (N, L, 128)

    cparams = pltpu.CompilerParams(
        dimension_semantics=("parallel",),         # megacore sharding on v7x
        vmem_limit_bytes=48 * 1024 * 1024,         # fits v7x 64 MiB VMEM w/ headroom
    )

    w_spec = pl.BlockSpec((KSIZE, CPAD, CPAD), lambda i: (0, 0, 0))   # VMEM-resident
    v_spec = pl.BlockSpec((1, CPAD), lambda i: (0, 0))                # VMEM-resident

    # --- kernel 1: encoder convs + partial BN stats, grid over batch rows ---
    h3, stats = pl.pallas_call(
        _encoder_kernel,
        grid=(N,),
        in_specs=[pl.BlockSpec((1, L, CPAD), lambda i: (i, 0, 0)),
                  w_spec, v_spec, w_spec, v_spec, w_spec, v_spec],
        out_specs=[pl.BlockSpec((1, L3, CPAD), lambda i: (i, 0, 0)),
                   pl.BlockSpec((1, 2, CPAD), lambda i: (i, 0, 0))],
        out_shape=[jax.ShapeDtypeStruct((N, L3, CPAD), jnp.float32),
                   jax.ShapeDtypeStruct((N, 2, CPAD), jnp.float32)],
        compiler_params=cparams,
    )(x, fused["w1"], fused["b1"], fused["w2"], fused["b2"], fused["w3"], fused["b3"])

    # --- tiny XLA reduction: fold training-mode BatchNorm (full-batch stats,
    #     biased variance, eps=1e-5) into a per-channel affine ---
    cnt = float(N * L3)
    tot = jnp.sum(stats, axis=0)                         # (2, 128)
    mean = tot[0] / cnt
    var = jnp.maximum(tot[1] / cnt - mean * mean, 0.0)
    scale = (fused["gamma"][0] * jax.lax.rsqrt(var + BN_EPS)).reshape(1, CPAD)
    shift = (fused["beta"][0] - mean * scale[0]).reshape(1, CPAD)

    # --- kernel 2: BN affine + pool/unpool + decoder convT, grid over batch ---
    out = pl.pallas_call(
        _decoder_kernel,
        grid=(N,),
        in_specs=[pl.BlockSpec((1, L3, CPAD), lambda i: (i, 0, 0)),
                  v_spec, v_spec,
                  w_spec, v_spec, w_spec, v_spec, w_spec, v_spec],
        out_specs=pl.BlockSpec((1, L, CPAD), lambda i: (i, 0, 0)),
        out_shape=jax.ShapeDtypeStruct((N, L, CPAD), jnp.float32),
        compiler_params=cparams,
    )(h3, scale, shift,
      fused["wt1"], fused["bt1"], fused["wt2"], fused["bt2"],
      fused["wt3"], fused["bt3"])

    return jnp.transpose(out[:, :, :C_in], (0, 2, 1))    # -> (N, C_in, L)


# ---------------------------------------------------------------------------
def make_params(key, in_channel=20, out_channel=128, K=KSIZE):
    ks = jax.random.split(key, 12)
    def conv_w(k, co, ci):   # PyTorch Conv1d weight (C_out, C_in, K) -> (K, C_in, C_out)
        w = jax.random.normal(k, (co, ci, K), jnp.float32) * (1.0 / (ci * K) ** 0.5)
        return jnp.transpose(w, (2, 1, 0))
    def convT_w(k, ci, co):  # PyTorch ConvTranspose1d weight layout (C_in, C_out, K)
        return jax.random.normal(k, (ci, co, K), jnp.float32) * (1.0 / (ci * K) ** 0.5)
    return dict(
        w1=conv_w(ks[0], 32, in_channel),    b1=jax.random.normal(ks[1], (32,)) * 0.05,
        w2=conv_w(ks[2], 64, 32),            b2=jax.random.normal(ks[3], (64,)) * 0.05,
        w3=conv_w(ks[4], out_channel, 64),   b3=jax.random.normal(ks[5], (out_channel,)) * 0.05,
        gamma=jnp.ones((out_channel,), jnp.float32),
        beta=jnp.zeros((out_channel,), jnp.float32),
        wt1=convT_w(ks[6], out_channel, 64), bt1=jax.random.normal(ks[7], (64,)) * 0.05,
        wt2=convT_w(ks[8], 64, 32),          bt2=jax.random.normal(ks[9], (32,)) * 0.05,
        wt3=convT_w(ks[10], 32, in_channel), bt3=jax.random.normal(ks[11], (in_channel,)) * 0.05,
    )


if __name__ == "__main__":
    key = jax.random.PRNGKey(0)
    k_x, k_p = jax.random.split(key)

    N, C_IN, L = 2, 20, 16   # small shapes consistent with the module (needs L >= 13)
    x = jax.random.normal(k_x, (N, C_IN, L), jnp.float32)      # PyTorch NCL input
    params = make_params(k_p, in_channel=C_IN, out_channel=128)
    fused = prepare_fused_params(params)                       # one-time weight prep

    out = jax.block_until_ready(audio_encoder_forward(x, fused))

    assert out.shape == (N, C_IN, L), out.shape
    assert bool(jnp.all(jnp.isfinite(out)))
    print("KERNEL_OK")
</pallas_src>

<mosaic_0001>
module attributes {stable_mosaic.version = 11 : i64} {
  func.func @_encoder_kernel(%arg0: i32, %arg1: memref<1x16x128xf32, #tpu.memory_space<vmem>>, %arg2: memref<4x128x128xbf16, #tpu.memory_space<vmem>>, %arg3: memref<1x128xf32, #tpu.memory_space<vmem>>, %arg4: memref<4x128x128xbf16, #tpu.memory_space<vmem>>, %arg5: memref<1x128xf32, #tpu.memory_space<vmem>>, %arg6: memref<4x128x128xbf16, #tpu.memory_space<vmem>>, %arg7: memref<1x128xf32, #tpu.memory_space<vmem>>, %arg8: memref<1x7x128xf32, #tpu.memory_space<vmem>>, %arg9: memref<1x2x128xf32, #tpu.memory_space<vmem>>) attributes {dimension_semantics = [#tpu.dimension_semantics<parallel>], iteration_bounds = array<i64: 2>, scalar_prefetch = 0 : i64, scratch_operands = 0 : i64, tpu.core_type = #tpu.core_type<tc>, window_params = [{transform_indices = @transform_0, window_bounds = array<i64: 1, 16, 128>}, {pipeline_mode = #tpu.pipeline_mode<synchronous>, transform_indices = @transform_1, window_bounds = array<i64: 4, 128, 128>}, {pipeline_mode = #tpu.pipeline_mode<synchronous>, transform_indices = @transform_2, window_bounds = array<i64: 1, 128>}, {pipeline_mode = #tpu.pipeline_mode<synchronous>, transform_indices = @transform_3, window_bounds = array<i64: 4, 128, 128>}, {pipeline_mode = #tpu.pipeline_mode<synchronous>, transform_indices = @transform_4, window_bounds = array<i64: 1, 128>}, {pipeline_mode = #tpu.pipeline_mode<synchronous>, transform_indices = @transform_5, window_bounds = array<i64: 4, 128, 128>}, {pipeline_mode = #tpu.pipeline_mode<synchronous>, transform_indices = @transform_6, window_bounds = array<i64: 1, 128>}, {transform_indices = @transform_7, window_bounds = array<i64: 1, 7, 128>}, {transform_indices = @transform_8, window_bounds = array<i64: 1, 2, 128>}]} {
    %c0 = arith.constant 0 : index
    %c0_0 = arith.constant 0 : index
    %c0_1 = arith.constant 0 : index
    %0 = vector.load %arg1[%c0, %c0_0, %c0_1] : memref<1x16x128xf32, #tpu.memory_space<vmem>>, vector<1x16x128xf32>
    %1 = vector.shape_cast %0 : vector<1x16x128xf32> to vector<16x128xf32>
    %2 = arith.truncf %1 : vector<16x128xf32> to vector<16x128xbf16>
    %3 = vector.extract_strided_slice %2 {offsets = [0, 0], sizes = [13, 128], strides = [1, 1]} : vector<16x128xbf16> to vector<13x128xbf16>
    %c0_2 = arith.constant 0 : index
    %c0_3 = arith.constant 0 : index
    %c0_4 = arith.constant 0 : index
    %4 = vector.load %arg2[%c0_2, %c0_3, %c0_4] : memref<4x128x128xbf16, #tpu.memory_space<vmem>>, vector<1x128x128xbf16>
    %5 = vector.shape_cast %4 : vector<1x128x128xbf16> to vector<128x128xbf16>
    %cst = arith.constant dense<0.000000e+00> : vector<13x128xf32>
    %6 = tpu.matmul %3, %5, %cst {dimension_numbers = #tpu.dot_dimension_numbers<[1], [0], [0], [1], [0, 0, 1, 1], [], []>} : vector<13x128xbf16>, vector<128x128xbf16>, vector<13x128xf32> -> vector<13x128xf32>
    %7 = vector.extract_strided_slice %2 {offsets = [1, 0], sizes = [13, 128], strides = [1, 1]} : vector<16x128xbf16> to vector<13x128xbf16>
    %c1 = arith.constant 1 : index
    %c0_5 = arith.constant 0 : index
    %c0_6 = arith.constant 0 : index
    %8 = vector.load %arg2[%c1, %c0_5, %c0_6] : memref<4x128x128xbf16, #tpu.memory_space<vmem>>, vector<1x128x128xbf16>
    %9 = vector.shape_cast %8 : vector<1x128x128xbf16> to vector<128x128xbf16>
    %cst_7 = arith.constant dense<0.000000e+00> : vector<13x128xf32>
    %10 = tpu.matmul %7, %9, %cst_7 {dimension_numbers = #tpu.dot_dimension_numbers<[1], [0], [0], [1], [0, 0, 1, 1], [], []>} : vector<13x128xbf16>, vector<128x128xbf16>, vector<13x128xf32> -> vector<13x128xf32>
    %11 = arith.addf %6, %10 : vector<13x128xf32>
    %12 = vector.extract_strided_slice %2 {offsets = [2, 0], sizes = [13, 128], strides = [1, 1]} : vector<16x128xbf16> to vector<13x128xbf16>
    %c2 = arith.constant 2 : index
    %c0_8 = arith.constant 0 : index
    %c0_9 = arith.constant 0 : index
    %13 = vector.load %arg2[%c2, %c0_8, %c0_9] : memref<4x128x128xbf16, #tpu.memory_space<vmem>>, vector<1x128x128xbf16>
    %14 = vector.shape_cast %13 : vector<1x128x128xbf16> to vector<128x128xbf16>
    %cst_10 = arith.constant dense<0.000000e+00> : vector<13x128xf32>
    %15 = tpu.matmul %12, %14, %cst_10 {dimension_numbers = #tpu.dot_dimension_numbers<[1], [0], [0], [1], [0, 0, 1, 1], [], []>} : vector<13x128xbf16>, vector<128x128xbf16>, vector<13x128xf32> -> vector<13x128xf32>
    %16 = arith.addf %11, %15 : vector<13x128xf32>
    %17 = vector.extract_strided_slice %2 {offsets = [3, 0], sizes = [13, 128], strides = [1, 1]} : vector<16x128xbf16> to vector<13x128xbf16>
    %c3 = arith.constant 3 : index
    %c0_11 = arith.constant 0 : index
    %c0_12 = arith.constant 0 : index
    %18 = vector.load %arg2[%c3, %c0_11, %c0_12] : memref<4x128x128xbf16, #tpu.memory_space<vmem>>, vector<1x128x128xbf16>
    %19 = vector.shape_cast %18 : vector<1x128x128xbf16> to vector<128x128xbf16>
    %cst_13 = arith.constant dense<0.000000e+00> : vector<13x128xf32>
    %20 = tpu.matmul %17, %19, %cst_13 {dimension_numbers = #tpu.dot_dimension_numbers<[1], [0], [0], [1], [0, 0, 1, 1], [], []>} : vector<13x128xbf16>, vector<128x128xbf16>, vector<13x128xf32> -> vector<13x128xf32>
    %21 = arith.addf %16, %20 : vector<13x128xf32>
    %c0_14 = arith.constant 0 : index
    %c0_15 = arith.constant 0 : index
    %22 = vector.load %arg3[%c0_14, %c0_15] : memref<1x128xf32, #tpu.memory_space<vmem>>, vector<1x128xf32>
    %23 = vector.broadcast %22 : vector<1x128xf32> to vector<13x128xf32>
    %24 = arith.addf %21, %23 : vector<13x128xf32>
    %25 = arith.truncf %24 : vector<13x128xf32> to vector<13x128xbf16>
    %26 = vector.extract_strided_slice %25 {offsets = [0, 0], sizes = [10, 128], strides = [1, 1]} : vector<13x128xbf16> to vector<10x128xbf16>
    %c0_16 = arith.constant 0 : index
    %c0_17 = arith.constant 0 : index
    %c0_18 = arith.constant 0 : index
    %27 = vector.load %arg4[%c0_16, %c0_17, %c0_18] : memref<4x128x128xbf16, #tpu.memory_space<vmem>>, vector<1x128x128xbf16>
    %28 = vector.shape_cast %27 : vector<1x128x128xbf16> to vector<128x128xbf16>
    %cst_19 = arith.constant dense<0.000000e+00> : vector<10x128xf32>
    %29 = tpu.matmul %26, %28, %cst_19 {dimension_numbers = #tpu.dot_dimension_numbers<[1], [0], [0], [1], [0, 0, 1, 1], [], []>} : vector<10x128xbf16>, vector<128x128xbf16>, vector<10x128xf32> -> vector<10x128xf32>
    %30 = vector.extract_strided_slice %25 {offsets = [1, 0], sizes = [10, 128], strides = [1, 1]} : vector<13x128xbf16> to vector<10x128xbf16>
    %c1_20 = arith.constant 1 : index
    %c0_21 = arith.constant 0 : index
    %c0_22 = arith.constant 0 : index
    %31 = vector.load %arg4[%c1_20, %c0_21, %c0_22] : memref<4x128x128xbf16, #tpu.memory_space<vmem>>, vector<1x128x128xbf16>
    %32 = vector.shape_cast %31 : vector<1x128x128xbf16> to vector<128x128xbf16>
    %cst_23 = arith.constant dense<0.000000e+00> : vector<10x128xf32>
    %33 = tpu.matmul %30, %32, %cst_23 {dimension_numbers = #tpu.dot_dimension_numbers<[1], [0], [0], [1], [0, 0, 1, 1], [], []>} : vector<10x128xbf16>, vector<128x128xbf16>, vector<10x128xf32> -> vector<10x128xf32>
    %34 = arith.addf %29, %33 : vector<10x128xf32>
    %35 = vector.extract_strided_slice %25 {offsets = [2, 0], sizes = [10, 128], strides = [1, 1]} : vector<13x128xbf16> to vector<10x128xbf16>
    %c2_24 = arith.constant 2 : index
    %c0_25 = arith.constant 0 : index
    %c0_26 = arith.constant 0 : index
    %36 = vector.load %arg4[%c2_24, %c0_25, %c0_26] : memref<4x128x128xbf16, #tpu.memory_space<vmem>>, vector<1x128x128xbf16>
    %37 = vector.shape_cast %36 : vector<1x128x128xbf16> to vector<128x128xbf16>
    %cst_27 = arith.constant dense<0.000000e+00> : vector<10x128xf32>
    %38 = tpu.matmul %35, %37, %cst_27 {dimension_numbers = #tpu.dot_dimension_numbers<[1], [0], [0], [1], [0, 0, 1, 1], [], []>} : vector<10x128xbf16>, vector<128x128xbf16>, vector<10x128xf32> -> vector<10x128xf32>
    %39 = arith.addf %34, %38 : vector<10x128xf32>
    %40 = vector.extract_strided_slice %25 {offsets = [3, 0], sizes = [10, 128], strides = [1, 1]} : vector<13x128xbf16> to vector<10x128xbf16>
    %c3_28 = arith.constant 3 : index
    %c0_29 = arith.constant 0 : index
    %c0_30 = arith.constant 0 : index
    %41 = vector.load %arg4[%c3_28, %c0_29, %c0_30] : memref<4x128x128xbf16, #tpu.memory_space<vmem>>, vector<1x128x128xbf16>
    %42 = vector.shape_cast %41 : vector<1x128x128xbf16> to vector<128x128xbf16>
    %cst_31 = arith.constant dense<0.000000e+00> : vector<10x128xf32>
    %43 = tpu.matmul %40, %42, %cst_31 {dimension_numbers = #tpu.dot_dimension_numbers<[1], [0], [0], [1], [0, 0, 1, 1], [], []>} : vector<10x128xbf16>, vector<128x128xbf16>, vector<10x128xf32> -> vector<10x128xf32>
    %44 = arith.addf %39, %43 : vector<10x128xf32>
    %c0_32 = arith.constant 0 : index
    %c0_33 = arith.constant 0 : index
    %45 = vector.load %arg5[%c0_32, %c0_33] : memref<1x128xf32, #tpu.memory_space<vmem>>, vector<1x128xf32>
    %46 = vector.broadcast %45 : vector<1x128xf32> to vector<10x128xf32>
    %47 = arith.addf %44, %46 : vector<10x128xf32>
    %48 = arith.truncf %47 : vector<10x128xf32> to vector<10x128xbf16>
    %49 = vector.extract_strided_slice %48 {offsets = [0, 0], sizes = [7, 128], strides = [1, 1]} : vector<10x128xbf16> to vector<7x128xbf16>
    %c0_34 = arith.constant 0 : index
    %c0_35 = arith.constant 0 : index
    %c0_36 = arith.constant 0 : index
    %50 = vector.load %arg6[%c0_34, %c0_35, %c0_36] : memref<4x128x128xbf16, #tpu.memory_space<vmem>>, vector<1x128x128xbf16>
    %51 = vector.shape_cast %50 : vector<1x128x128xbf16> to vector<128x128xbf16>
    %cst_37 = arith.constant dense<0.000000e+00> : vector<7x128xf32>
    %52 = tpu.matmul %49, %51, %cst_37 {dimension_numbers = #tpu.dot_dimension_numbers<[1], [0], [0], [1], [0, 0, 1, 1], [], []>} : vector<7x128xbf16>, vector<128x128xbf16>, vector<7x128xf32> -> vector<7x128xf32>
    %53 = vector.extract_strided_slice %48 {offsets = [1, 0], sizes = [7, 128], strides = [1, 1]} : vector<10x128xbf16> to vector<7x128xbf16>
    %c1_38 = arith.constant 1 : index
    %c0_39 = arith.constant 0 : index
    %c0_40 = arith.constant 0 : index
    %54 = vector.load %arg6[%c1_38, %c0_39, %c0_40] : memref<4x128x128xbf16, #tpu.memory_space<vmem>>, vector<1x128x128xbf16>
    %55 = vector.shape_cast %54 : vector<1x128x128xbf16> to vector<128x128xbf16>
    %cst_41 = arith.constant dense<0.000000e+00> : vector<7x128xf32>
    %56 = tpu.matmul %53, %55, %cst_41 {dimension_numbers = #tpu.dot_dimension_numbers<[1], [0], [0], [1], [0, 0, 1, 1], [], []>} : vector<7x128xbf16>, vector<128x128xbf16>, vector<7x128xf32> -> vector<7x128xf32>
    %57 = arith.addf %52, %56 : vector<7x128xf32>
    %58 = vector.extract_strided_slice %48 {offsets = [2, 0], sizes = [7, 128], strides = [1, 1]} : vector<10x128xbf16> to vector<7x128xbf16>
    %c2_42 = arith.constant 2 : index
    %c0_43 = arith.constant 0 : index
    %c0_44 = arith.constant 0 : index
    %59 = vector.load %arg6[%c2_42, %c0_43, %c0_44] : memref<4x128x128xbf16, #tpu.memory_space<vmem>>, vector<1x128x128xbf16>
    %60 = vector.shape_cast %59 : vector<1x128x128xbf16> to vector<128x128xbf16>
    %cst_45 = arith.constant dense<0.000000e+00> : vector<7x128xf32>
    %61 = tpu.matmul %58, %60, %cst_45 {dimension_numbers = #tpu.dot_dimension_numbers<[1], [0], [0], [1], [0, 0, 1, 1], [], []>} : vector<7x128xbf16>, vector<128x128xbf16>, vector<7x128xf32> -> vector<7x128xf32>
    %62 = arith.addf %57, %61 : vector<7x128xf32>
    %63 = vector.extract_strided_slice %48 {offsets = [3, 0], sizes = [7, 128], strides = [1, 1]} : vector<10x128xbf16> to vector<7x128xbf16>
    %c3_46 = arith.constant 3 : index
    %c0_47 = arith.constant 0 : index
    %c0_48 = arith.constant 0 : index
    %64 = vector.load %arg6[%c3_46, %c0_47, %c0_48] : memref<4x128x128xbf16, #tpu.memory_space<vmem>>, vector<1x128x128xbf16>
    %65 = vector.shape_cast %64 : vector<1x128x128xbf16> to vector<128x128xbf16>
    %cst_49 = arith.constant dense<0.000000e+00> : vector<7x128xf32>
    %66 = tpu.matmul %63, %65, %cst_49 {dimension_numbers = #tpu.dot_dimension_numbers<[1], [0], [0], [1], [0, 0, 1, 1], [], []>} : vector<7x128xbf16>, vector<128x128xbf16>, vector<7x128xf32> -> vector<7x128xf32>
    %67 = arith.addf %62, %66 : vector<7x128xf32>
    %c0_50 = arith.constant 0 : index
    %c0_51 = arith.constant 0 : index
    %68 = vector.load %arg7[%c0_50, %c0_51] : memref<1x128xf32, #tpu.memory_space<vmem>>, vector<1x128xf32>
    %69 = vector.broadcast %68 : vector<1x128xf32> to vector<7x128xf32>
    %70 = arith.addf %67, %69 : vector<7x128xf32>
    %c0_52 = arith.constant 0 : index
    %c0_53 = arith.constant 0 : index
    %c0_54 = arith.constant 0 : index
    %71 = vector.load %arg8[%c0_52, %c0_53, %c0_54] : memref<1x7x128xf32, #tpu.memory_space<vmem>>, vector<1x7x128xf32>
    %72 = vector.shape_cast %71 : vector<1x7x128xf32> to vector<7x128xf32>
    %73 = vector.shape_cast %70 : vector<7x128xf32> to vector<1x7x128xf32>
    tpu.vector_store %arg8[%c0_52, %c0_53, %c0_54], %73 {strides = array<i32>} : memref<1x7x128xf32, #tpu.memory_space<vmem>>, vector<1x7x128xf32>,
    %cst_55 = arith.constant dense<0.000000e+00> : vector<128xf32>
    %74 = vector.multi_reduction <add>, %70, %cst_55 [0] : vector<7x128xf32> to vector<128xf32>
    %75 = vector.shape_cast %74 : vector<128xf32> to vector<1x128xf32>
    %76 = arith.mulf %70, %70 : vector<7x128xf32>
    %cst_56 = arith.constant dense<0.000000e+00> : vector<128xf32>
    %77 = vector.multi_reduction <add>, %76, %cst_56 [0] : vector<7x128xf32> to vector<128xf32>
    %78 = vector.shape_cast %77 : vector<128xf32> to vector<1x128xf32>
    %79 = tpu.concatenate %75, %78 in 0 : vector<1x128xf32>, vector<1x128xf32> -> vector<2x128xf32>
    %c0_57 = arith.constant 0 : index
    %c0_58 = arith.constant 0 : index
    %c0_59 = arith.constant 0 : index
    %80 = vector.load %arg9[%c0_57, %c0_58, %c0_59] : memref<1x2x128xf32, #tpu.memory_space<vmem>>, vector<1x2x128xf32>
    %81 = vector.shape_cast %80 : vector<1x2x128xf32> to vector<2x128xf32>
    %82 = vector.shape_cast %79 : vector<2x128xf32> to vector<1x2x128xf32>
    tpu.vector_store %arg9[%c0_57, %c0_58, %c0_59], %82 {strides = array<i32>} : memref<1x2x128xf32, #tpu.memory_space<vmem>>, vector<1x2x128xf32>,
    return
  }
  func.func @transform_0(%arg0: i32) -> (i32, i32, i32) {
    %c0_i32 = arith.constant 0 : i32
    %c0_i32_0 = arith.constant 0 : i32
    %c0_i32_1 = arith.constant 0 : i32
    return %arg0, %c0_i32, %c0_i32_0 : i32, i32, i32
  }
  func.func @transform_1(%arg0: i32) -> (i32, i32, i32) {
    %c0_i32 = arith.constant 0 : i32
    %c0_i32_0 = arith.constant 0 : i32
    %c0_i32_1 = arith.constant 0 : i32
    %c0_i32_2 = arith.constant 0 : i32
    return %c0_i32, %c0_i32_0, %c0_i32_1 : i32, i32, i32
  }
  func.func @transform_2(%arg0: i32) -> (i32, i32) {
    %c0_i32 = arith.constant 0 : i32
    %c0_i32_0 = arith.constant 0 : i32
    %c0_i32_1 = arith.constant 0 : i32
    return %c0_i32, %c0_i32_0 : i32, i32
  }
  func.func @transform_3(%arg0: i32) -> (i32, i32, i32) {
    %c0_i32 = arith.constant 0 : i32
    %c0_i32_0 = arith.constant 0 : i32
    %c0_i32_1 = arith.constant 0 : i32
    %c0_i32_2 = arith.constant 0 : i32
    return %c0_i32, %c0_i32_0, %c0_i32_1 : i32, i32, i32
  }
  func.func @transform_4(%arg0: i32) -> (i32, i32) {
    %c0_i32 = arith.constant 0 : i32
    %c0_i32_0 = arith.constant 0 : i32
    %c0_i32_1 = arith.constant 0 : i32
    return %c0_i32, %c0_i32_0 : i32, i32
  }
  func.func @transform_5(%arg0: i32) -> (i32, i32, i32) {
    %c0_i32 = arith.constant 0 : i32
    %c0_i32_0 = arith.constant 0 : i32
    %c0_i32_1 = arith.constant 0 : i32
    %c0_i32_2 = arith.constant 0 : i32
    return %c0_i32, %c0_i32_0, %c0_i32_1 : i32, i32, i32
  }
  func.func @transform_6(%arg0: i32) -> (i32, i32) {
    %c0_i32 = arith.constant 0 : i32
    %c0_i32_0 = arith.constant 0 : i32
    %c0_i32_1 = arith.constant 0 : i32
    return %c0_i32, %c0_i32_0 : i32, i32
  }
  func.func @transform_7(%arg0: i32) -> (i32, i32, i32) {
    %c0_i32 = arith.constant 0 : i32
    %c0_i32_0 = arith.constant 0 : i32
    %c0_i32_1 = arith.constant 0 : i32
    return %arg0, %c0_i32, %c0_i32_0 : i32, i32, i32
  }
  func.func @transform_8(%arg0: i32) -> (i32, i32, i32) {
    %c0_i32 = arith.constant 0 : i32
    %c0_i32_0 = arith.constant 0 : i32
    %c0_i32_1 = arith.constant 0 : i32
    return %arg0, %c0_i32, %c0_i32_0 : i32, i32, i32
  }
}

module attributes {stable_mosaic.version = 11 : i64} {
  func.func @_decoder_kernel(%arg0: i32, %arg1: memref<1x7x128xf32, #tpu.memory_space<vmem>>, %arg2: memref<1x128xf32, #tpu.memory_space<vmem>>, %arg3: memref<1x128xf32, #tpu.memory_space<vmem>>, %arg4: memref<4x128x128xbf16, #tpu.memory_space<vmem>>, %arg5: memref<1x128xf32, #tpu.memory_space<vmem>>, %arg6: memref<4x128x128xbf16, #tpu.memory_space<vmem>>, %arg7: memref<1x128xf32, #tpu.memory_space<vmem>>, %arg8: memref<4x128x128xbf16, #tpu.memory_space<vmem>>, %arg9: memref<1x128xf32, #tpu.memory_space<vmem>>, %arg10: memref<1x16x128xf32, #tpu.memory_space<vmem>>) attributes {dimension_semantics = [#tpu.dimension_semantics<parallel>], iteration_bounds = array<i64: 2>, scalar_prefetch = 0 : i64, scratch_operands = 0 : i64, tpu.core_type = #tpu.core_type<tc>, window_params = [{transform_indices = @transform_0, window_bounds = array<i64: 1, 7, 128>}, {pipeline_mode = #tpu.pipeline_mode<synchronous>, transform_indices = @transform_1, window_bounds = array<i64: 1, 128>}, {pipeline_mode = #tpu.pipeline_mode<synchronous>, transform_indices = @transform_2, window_bounds = array<i64: 1, 128>}, {pipeline_mode = #tpu.pipeline_mode<synchronous>, transform_indices = @transform_3, window_bounds = array<i64: 4, 128, 128>}, {pipeline_mode = #tpu.pipeline_mode<synchronous>, transform_indices = @transform_4, window_bounds = array<i64: 1, 128>}, {pipeline_mode = #tpu.pipeline_mode<synchronous>, transform_indices = @transform_5, window_bounds = array<i64: 4, 128, 128>}, {pipeline_mode = #tpu.pipeline_mode<synchronous>, transform_indices = @transform_6, window_bounds = array<i64: 1, 128>}, {pipeline_mode = #tpu.pipeline_mode<synchronous>, transform_indices = @transform_7, window_bounds = array<i64: 4, 128, 128>}, {pipeline_mode = #tpu.pipeline_mode<synchronous>, transform_indices = @transform_8, window_bounds = array<i64: 1, 128>}, {transform_indices = @transform_9, window_bounds = array<i64: 1, 16, 128>}]} {
    %c0 = arith.constant 0 : index
    %c0_0 = arith.constant 0 : index
    %c0_1 = arith.constant 0 : index
    %0 = vector.load %arg1[%c0, %c0_0, %c0_1] : memref<1x7x128xf32, #tpu.memory_space<vmem>>, vector<1x7x128xf32>
    %1 = vector.shape_cast %0 : vector<1x7x128xf32> to vector<7x128xf32>
    %c0_2 = arith.constant 0 : index
    %c0_3 = arith.constant 0 : index
    %2 = vector.load %arg2[%c0_2, %c0_3] : memref<1x128xf32, #tpu.memory_space<vmem>>, vector<1x128xf32>
    %3 = vector.broadcast %2 : vector<1x128xf32> to vector<7x128xf32>
    %4 = arith.mulf %1, %3 : vector<7x128xf32>
    %c0_4 = arith.constant 0 : index
    %c0_5 = arith.constant 0 : index
    %5 = vector.load %arg3[%c0_4, %c0_5] : memref<1x128xf32, #tpu.memory_space<vmem>>, vector<1x128xf32>
    %6 = vector.broadcast %5 : vector<1x128xf32> to vector<7x128xf32>
    %7 = arith.addf %4, %6 : vector<7x128xf32>
    %8 = tpu.iota {dimensions = array<i32: 0>} : vector<4x128xi32>
    %9 = vector.extract_strided_slice %7 {offsets = [0, 0], sizes = [4, 128], strides = [1, 1]} : vector<7x128xf32> to vector<4x128xf32>
    %10 = vector.extract_strided_slice %7 {offsets = [1, 0], sizes = [4, 128], strides = [1, 1]} : vector<7x128xf32> to vector<4x128xf32>
    %11 = arith.cmpf ogt, %10, %9 : vector<4x128xf32>
    %c1_i32 = arith.constant 1 : i32
    %12 = vector.broadcast %c1_i32 : i32 to vector<4x128xi32>
    %13 = arith.addi %8, %12 : vector<4x128xi32>
    %14 = arith.select %11, %13, %8 : vector<4x128xi1>, vector<4x128xi32>
    %15 = arith.maximumf %9, %10 : vector<4x128xf32>
    %16 = vector.extract_strided_slice %7 {offsets = [2, 0], sizes = [4, 128], strides = [1, 1]} : vector<7x128xf32> to vector<4x128xf32>
    %17 = arith.cmpf ogt, %16, %15 : vector<4x128xf32>
    %c2_i32 = arith.constant 2 : i32
    %18 = vector.broadcast %c2_i32 : i32 to vector<4x128xi32>
    %19 = arith.addi %8, %18 : vector<4x128xi32>
    %20 = arith.select %17, %19, %14 : vector<4x128xi1>, vector<4x128xi32>
    %21 = arith.maximumf %15, %16 : vector<4x128xf32>
    %22 = vector.extract_strided_slice %7 {offsets = [3, 0], sizes = [4, 128], strides = [1, 1]} : vector<7x128xf32> to vector<4x128xf32>
    %23 = arith.cmpf ogt, %22, %21 : vector<4x128xf32>
    %c3_i32 = arith.constant 3 : i32
    %24 = vector.broadcast %c3_i32 : i32 to vector<4x128xi32>
    %25 = arith.addi %8, %24 : vector<4x128xi32>
    %26 = arith.select %23, %25, %20 : vector<4x128xi1>, vector<4x128xi32>
    %27 = arith.maximumf %21, %22 : vector<4x128xf32>
    %28 = arith.subi %26, %8 : vector<4x128xi32>
    %cst = arith.constant 0.000000e+00 : f32
    %29 = vector.broadcast %cst : f32 to vector<7x128xf32>
    %c0_i32 = arith.constant 0 : i32
    %30 = vector.broadcast %c0_i32 : i32 to vector<4x128xi32>
    %31 = arith.cmpi eq, %28, %30 : vector<4x128xi32>
    %cst_6 = arith.constant 1.000000e+00 : f32
    %cst_7 = arith.constant 0.000000e+00 : f32
    %32 = vector.broadcast %cst_6 : f32 to vector<4x128xf32>
    %33 = vector.broadcast %cst_7 : f32 to vector<4x128xf32>
    %34 = arith.select %31, %32, %33 : vector<4x128xi1>, vector<4x128xf32>
    %cst_8 = arith.constant 0.000000e+00 : f32
    %35 = vector.broadcast %cst_8 : f32 to vector<3x128xf32>
    %cst_9 = arith.constant 0.000000e+00 : f32
    %36 = vector.broadcast %cst_9 : f32 to vector<3x128xf32>
    %37 = tpu.concatenate %27, %35 in 0 : vector<4x128xf32>, vector<3x128xf32> -> vector<7x128xf32>
    %38 = tpu.concatenate %34, %36 in 0 : vector<4x128xf32>, vector<3x128xf32> -> vector<7x128xf32>
    %cst_10 = arith.constant 5.000000e-01 : f32
    %39 = vector.broadcast %cst_10 : f32 to vector<7x128xf32>
    %40 = arith.cmpf ogt, %38, %39 : vector<7x128xf32>
    %41 = arith.select %40, %37, %29 : vector<7x128xi1>, vector<7x128xf32>
    %c1_i32_11 = arith.constant 1 : i32
    %42 = vector.broadcast %c1_i32_11 : i32 to vector<4x128xi32>
    %43 = arith.cmpi eq, %28, %42 : vector<4x128xi32>
    %cst_12 = arith.constant 1.000000e+00 : f32
    %cst_13 = arith.constant 0.000000e+00 : f32
    %44 = vector.broadcast %cst_12 : f32 to vector<4x128xf32>
    %45 = vector.broadcast %cst_13 : f32 to vector<4x128xf32>
    %46 = arith.select %43, %44, %45 : vector<4x128xi1>, vector<4x128xf32>
    %cst_14 = arith.constant 0.000000e+00 : f32
    %47 = vector.broadcast %cst_14 : f32 to vector<1x128xf32>
    %cst_15 = arith.constant 0.000000e+00 : f32
    %48 = vector.broadcast %cst_15 : f32 to vector<1x128xf32>
    %cst_16 = arith.constant 0.000000e+00 : f32
    %49 = vector.broadcast %cst_16 : f32 to vector<2x128xf32>
    %cst_17 = arith.constant 0.000000e+00 : f32
    %50 = vector.broadcast %cst_17 : f32 to vector<2x128xf32>
    %51 = tpu.concatenate %47, %27, %49 in 0 : vector<1x128xf32>, vector<4x128xf32>, vector<2x128xf32> -> vector<7x128xf32>
    %52 = tpu.concatenate %48, %46, %50 in 0 : vector<1x128xf32>, vector<4x128xf32>, vector<2x128xf32> -> vector<7x128xf32>
    %cst_18 = arith.constant 5.000000e-01 : f32
    %53 = vector.broadcast %cst_18 : f32 to vector<7x128xf32>
    %54 = arith.cmpf ogt, %52, %53 : vector<7x128xf32>
    %55 = arith.select %54, %51, %41 : vector<7x128xi1>, vector<7x128xf32>
    %c2_i32_19 = arith.constant 2 : i32
    %56 = vector.broadcast %c2_i32_19 : i32 to vector<4x128xi32>
    %57 = arith.cmpi eq, %28, %56 : vector<4x128xi32>
    %cst_20 = arith.constant 1.000000e+00 : f32
    %cst_21 = arith.constant 0.000000e+00 : f32
    %58 = vector.broadcast %cst_20 : f32 to vector<4x128xf32>
    %59 = vector.broadcast %cst_21 : f32 to vector<4x128xf32>
    %60 = arith.select %57, %58, %59 : vector<4x128xi1>, vector<4x128xf32>
    %cst_22 = arith.constant 0.000000e+00 : f32
    %61 = vector.broadcast %cst_22 : f32 to vector<2x128xf32>
    %cst_23 = arith.constant 0.000000e+00 : f32
    %62 = vector.broadcast %cst_23 : f32 to vector<2x128xf32>
    %cst_24 = arith.constant 0.000000e+00 : f32
    %63 = vector.broadcast %cst_24 : f32 to vector<1x128xf32>
    %cst_25 = arith.constant 0.000000e+00 : f32
    %64 = vector.broadcast %cst_25 : f32 to vector<1x128xf32>
    %65 = tpu.concatenate %61, %27, %63 in 0 : vector<2x128xf32>, vector<4x128xf32>, vector<1x128xf32> -> vector<7x128xf32>
    %66 = tpu.concatenate %62, %60, %64 in 0 : vector<2x128xf32>, vector<4x128xf32>, vector<1x128xf32> -> vector<7x128xf32>
    %cst_26 = arith.constant 5.000000e-01 : f32
    %67 = vector.broadcast %cst_26 : f32 to vector<7x128xf32>
    %68 = arith.cmpf ogt, %66, %67 : vector<7x128xf32>
    %69 = arith.select %68, %65, %55 : vector<7x128xi1>, vector<7x128xf32>
    %c3_i32_27 = arith.constant 3 : i32
    %70 = vector.broadcast %c3_i32_27 : i32 to vector<4x128xi32>
    %71 = arith.cmpi eq, %28, %70 : vector<4x128xi32>
    %cst_28 = arith.constant 1.000000e+00 : f32
    %cst_29 = arith.constant 0.000000e+00 : f32
    %72 = vector.broadcast %cst_28 : f32 to vector<4x128xf32>
    %73 = vector.broadcast %cst_29 : f32 to vector<4x128xf32>
    %74 = arith.select %71, %72, %73 : vector<4x128xi1>, vector<4x128xf32>
    %cst_30 = arith.constant 0.000000e+00 : f32
    %75 = vector.broadcast %cst_30 : f32 to vector<3x128xf32>
    %cst_31 = arith.constant 0.000000e+00 : f32
    %76 = vector.broadcast %cst_31 : f32 to vector<3x128xf32>
    %77 = tpu.concatenate %75, %27 in 0 : vector<3x128xf32>, vector<4x128xf32> -> vector<7x128xf32>
    %78 = tpu.concatenate %76, %74 in 0 : vector<3x128xf32>, vector<4x128xf32> -> vector<7x128xf32>
    %cst_32 = arith.constant 5.000000e-01 : f32
    %79 = vector.broadcast %cst_32 : f32 to vector<7x128xf32>
    %80 = arith.cmpf ogt, %78, %79 : vector<7x128xf32>
    %81 = arith.select %80, %77, %69 : vector<7x128xi1>, vector<7x128xf32>
    %cst_33 = arith.constant 0.000000e+00 : f32
    %82 = vector.broadcast %cst_33 : f32 to vector<3x128xf32>
    %83 = tpu.concatenate %82, %81, %82 in 0 : vector<3x128xf32>, vector<7x128xf32>, vector<3x128xf32> -> vector<13x128xf32>
    %84 = arith.truncf %83 : vector<13x128xf32> to vector<13x128xbf16>
    %85 = vector.extract_strided_slice %84 {offsets = [0, 0], sizes = [10, 128], strides = [1, 1]} : vector<13x128xbf16> to vector<10x128xbf16>
    %c0_34 = arith.constant 0 : index
    %c0_35 = arith.constant 0 : index
    %c0_36 = arith.constant 0 : index
    %86 = vector.load %arg4[%c0_34, %c0_35, %c0_36] : memref<4x128x128xbf16, #tpu.memory_space<vmem>>, vector<1x128x128xbf16>
    %87 = vector.shape_cast %86 : vector<1x128x128xbf16> to vector<128x128xbf16>
    %cst_37 = arith.constant dense<0.000000e+00> : vector<10x128xf32>
    %88 = tpu.matmul %85, %87, %cst_37 {dimension_numbers = #tpu.dot_dimension_numbers<[1], [0], [0], [1], [0, 0, 1, 1], [], []>} : vector<10x128xbf16>, vector<128x128xbf16>, vector<10x128xf32> -> vector<10x128xf32>
    %89 = vector.extract_strided_slice %84 {offsets = [1, 0], sizes = [10, 128], strides = [1, 1]} : vector<13x128xbf16> to vector<10x128xbf16>
    %c1 = arith.constant 1 : index
    %c0_38 = arith.constant 0 : index
    %c0_39 = arith.constant 0 : index
    %90 = vector.load %arg4[%c1, %c0_38, %c0_39] : memref<4x128x128xbf16, #tpu.memory_space<vmem>>, vector<1x128x128xbf16>
    %91 = vector.shape_cast %90 : vector<1x128x128xbf16> to vector<128x128xbf16>
    %cst_40 = arith.constant dense<0.000000e+00> : vector<10x128xf32>
    %92 = tpu.matmul %89, %91, %cst_40 {dimension_numbers = #tpu.dot_dimension_numbers<[1], [0], [0], [1], [0, 0, 1, 1], [], []>} : vector<10x128xbf16>, vector<128x128xbf16>, vector<10x128xf32> -> vector<10x128xf32>
    %93 = arith.addf %88, %92 : vector<10x128xf32>
    %94 = vector.extract_strided_slice %84 {offsets = [2, 0], sizes = [10, 128], strides = [1, 1]} : vector<13x128xbf16> to vector<10x128xbf16>
    %c2 = arith.constant 2 : index
    %c0_41 = arith.constant 0 : index
    %c0_42 = arith.constant 0 : index
    %95 = vector.load %arg4[%c2, %c0_41, %c0_42] : memref<4x128x128xbf16, #tpu.memory_space<vmem>>, vector<1x128x128xbf16>
    %96 = vector.shape_cast %95 : vector<1x128x128xbf16> to vector<128x128xbf16>
    %cst_43 = arith.constant dense<0.000000e+00> : vector<10x128xf32>
    %97 = tpu.matmul %94, %96, %cst_43 {dimension_numbers = #tpu.dot_dimension_numbers<[1], [0], [0], [1], [0, 0, 1, 1], [], []>} : vector<10x128xbf16>, vector<128x128xbf16>, vector<10x128xf32> -> vector<10x128xf32>
    %98 = arith.addf %93, %97 : vector<10x128xf32>
    %99 = vector.extract_strided_slice %84 {offsets = [3, 0], sizes = [10, 128], strides = [1, 1]} : vector<13x128xbf16> to vector<10x128xbf16>
    %c3 = arith.constant 3 : index
    %c0_44 = arith.constant 0 : index
    %c0_45 = arith.constant 0 : index
    %100 = vector.load %arg4[%c3, %c0_44, %c0_45] : memref<4x128x128xbf16, #tpu.memory_space<vmem>>, vector<1x128x128xbf16>
    %101 = vector.shape_cast %100 : vector<1x128x128xbf16> to vector<128x128xbf16>
    %cst_46 = arith.constant dense<0.000000e+00> : vector<10x128xf32>
    %102 = tpu.matmul %99, %101, %cst_46 {dimension_numbers = #tpu.dot_dimension_numbers<[1], [0], [0], [1], [0, 0, 1, 1], [], []>} : vector<10x128xbf16>, vector<128x128xbf16>, vector<10x128xf32> -> vector<10x128xf32>
    %103 = arith.addf %98, %102 : vector<10x128xf32>
    %c0_47 = arith.constant 0 : index
    %c0_48 = arith.constant 0 : index
    %104 = vector.load %arg5[%c0_47, %c0_48] : memref<1x128xf32, #tpu.memory_space<vmem>>, vector<1x128xf32>
    %105 = vector.broadcast %104 : vector<1x128xf32> to vector<10x128xf32>
    %106 = arith.addf %103, %105 : vector<10x128xf32>
    %cst_49 = arith.constant 0.000000e+00 : f32
    %107 = vector.broadcast %cst_49 : f32 to vector<3x128xf32>
    %108 = tpu.concatenate %107, %106, %107 in 0 : vector<3x128xf32>, vector<10x128xf32>, vector<3x128xf32> -> vector<16x128xf32>
    %109 = arith.truncf %108 : vector<16x128xf32> to vector<16x128xbf16>
    %110 = vector.extract_strided_slice %109 {offsets = [0, 0], sizes = [13, 128], strides = [1, 1]} : vector<16x128xbf16> to vector<13x128xbf16>
    %c0_50 = arith.constant 0 : index
    %c0_51 = arith.constant 0 : index
    %c0_52 = arith.constant 0 : index
    %111 = vector.load %arg6[%c0_50, %c0_51, %c0_52] : memref<4x128x128xbf16, #tpu.memory_space<vmem>>, vector<1x128x128xbf16>
    %112 = vector.shape_cast %111 : vector<1x128x128xbf16> to vector<128x128xbf16>
    %cst_53 = arith.constant dense<0.000000e+00> : vector<13x128xf32>
    %113 = tpu.matmul %110, %112, %cst_53 {dimension_numbers = #tpu.dot_dimension_numbers<[1], [0], [0], [1], [0, 0, 1, 1], [], []>} : vector<13x128xbf16>, vector<128x128xbf16>, vector<13x128xf32> -> vector<13x128xf32>
    %114 = vector.extract_strided_slice %109 {offsets = [1, 0], sizes = [13, 128], strides = [1, 1]} : vector<16x128xbf16> to vector<13x128xbf16>
    %c1_54 = arith.constant 1 : index
    %c0_55 = arith.constant 0 : index
    %c0_56 = arith.constant 0 : index
    %115 = vector.load %arg6[%c1_54, %c0_55, %c0_56] : memref<4x128x128xbf16, #tpu.memory_space<vmem>>, vector<1x128x128xbf16>
    %116 = vector.shape_cast %115 : vector<1x128x128xbf16> to vector<128x128xbf16>
    %cst_57 = arith.constant dense<0.000000e+00> : vector<13x128xf32>
    %117 = tpu.matmul %114, %116, %cst_57 {dimension_numbers = #tpu.dot_dimension_numbers<[1], [0], [0], [1], [0, 0, 1, 1], [], []>} : vector<13x128xbf16>, vector<128x128xbf16>, vector<13x128xf32> -> vector<13x128xf32>
    %118 = arith.addf %113, %117 : vector<13x128xf32>
    %119 = vector.extract_strided_slice %109 {offsets = [2, 0], sizes = [13, 128], strides = [1, 1]} : vector<16x128xbf16> to vector<13x128xbf16>
    %c2_58 = arith.constant 2 : index
    %c0_59 = arith.constant 0 : index
    %c0_60 = arith.constant 0 : index
    %120 = vector.load %arg6[%c2_58, %c0_59, %c0_60] : memref<4x128x128xbf16, #tpu.memory_space<vmem>>, vector<1x128x128xbf16>
    %121 = vector.shape_cast %120 : vector<1x128x128xbf16> to vector<128x128xbf16>
    %cst_61 = arith.constant dense<0.000000e+00> : vector<13x128xf32>
    %122 = tpu.matmul %119, %121, %cst_61 {dimension_numbers = #tpu.dot_dimension_numbers<[1], [0], [0], [1], [0, 0, 1, 1], [], []>} : vector<13x128xbf16>, vector<128x128xbf16>, vector<13x128xf32> -> vector<13x128xf32>
    %123 = arith.addf %118, %122 : vector<13x128xf32>
    %124 = vector.extract_strided_slice %109 {offsets = [3, 0], sizes = [13, 128], strides = [1, 1]} : vector<16x128xbf16> to vector<13x128xbf16>
    %c3_62 = arith.constant 3 : index
    %c0_63 = arith.constant 0 : index
    %c0_64 = arith.constant 0 : index
    %125 = vector.load %arg6[%c3_62, %c0_63, %c0_64] : memref<4x128x128xbf16, #tpu.memory_space<vmem>>, vector<1x128x128xbf16>
    %126 = vector.shape_cast %125 : vector<1x128x128xbf16> to vector<128x128xbf16>
    %cst_65 = arith.constant dense<0.000000e+00> : vector<13x128xf32>
    %127 = tpu.matmul %124, %126, %cst_65 {dimension_numbers = #tpu.dot_dimension_numbers<[1], [0], [0], [1], [0, 0, 1, 1], [], []>} : vector<13x128xbf16>, vector<128x128xbf16>, vector<13x128xf32> -> vector<13x128xf32>
    %128 = arith.addf %123, %127 : vector<13x128xf32>
    %c0_66 = arith.constant 0 : index
    %c0_67 = arith.constant 0 : index
    %129 = vector.load %arg7[%c0_66, %c0_67] : memref<1x128xf32, #tpu.memory_space<vmem>>, vector<1x128xf32>
    %130 = vector.broadcast %129 : vector<1x128xf32> to vector<13x128xf32>
    %131 = arith.addf %128, %130 : vector<13x128xf32>
    %cst_68 = arith.constant 0.000000e+00 : f32
    %132 = vector.broadcast %cst_68 : f32 to vector<3x128xf32>
    %133 = tpu.concatenate %132, %131, %132 in 0 : vector<3x128xf32>, vector<13x128xf32>, vector<3x128xf32> -> vector<19x128xf32>
    %134 = arith.truncf %133 : vector<19x128xf32> to vector<19x128xbf16>
    %135 = vector.extract_strided_slice %134 {offsets = [0, 0], sizes = [16, 128], strides = [1, 1]} : vector<19x128xbf16> to vector<16x128xbf16>
    %c0_69 = arith.constant 0 : index
    %c0_70 = arith.constant 0 : index
    %c0_71 = arith.constant 0 : index
    %136 = vector.load %arg8[%c0_69, %c0_70, %c0_71] : memref<4x128x128xbf16, #tpu.memory_space<vmem>>, vector<1x128x128xbf16>
    %137 = vector.shape_cast %136 : vector<1x128x128xbf16> to vector<128x128xbf16>
    %cst_72 = arith.constant dense<0.000000e+00> : vector<16x128xf32>
    %138 = tpu.matmul %135, %137, %cst_72 {dimension_numbers = #tpu.dot_dimension_numbers<[1], [0], [0], [1], [0, 0, 1, 1], [], []>} : vector<16x128xbf16>, vector<128x128xbf16>, vector<16x128xf32> -> vector<16x128xf32>
    %139 = vector.extract_strided_slice %134 {offsets = [1, 0], sizes = [16, 128], strides = [1, 1]} : vector<19x128xbf16> to vector<16x128xbf16>
    %c1_73 = arith.constant 1 : index
    %c0_74 = arith.constant 0 : index
    %c0_75 = arith.constant 0 : index
    %140 = vector.load %arg8[%c1_73, %c0_74, %c0_75] : memref<4x128x128xbf16, #tpu.memory_space<vmem>>, vector<1x128x128xbf16>
    %141 = vector.shape_cast %140 : vector<1x128x128xbf16> to vector<128x128xbf16>
    %cst_76 = arith.constant dense<0.000000e+00> : vector<16x128xf32>
    %142 = tpu.matmul %139, %141, %cst_76 {dimension_numbers = #tpu.dot_dimension_numbers<[1], [0], [0], [1], [0, 0, 1, 1], [], []>} : vector<16x128xbf16>, vector<128x128xbf16>, vector<16x128xf32> -> vector<16x128xf32>
    %143 = arith.addf %138, %142 : vector<16x128xf32>
    %144 = vector.extract_strided_slice %134 {offsets = [2, 0], sizes = [16, 128], strides = [1, 1]} : vector<19x128xbf16> to vector<16x128xbf16>
    %c2_77 = arith.constant 2 : index
    %c0_78 = arith.constant 0 : index
    %c0_79 = arith.constant 0 : index
    %145 = vector.load %arg8[%c2_77, %c0_78, %c0_79] : memref<4x128x128xbf16, #tpu.memory_space<vmem>>, vector<1x128x128xbf16>
    %146 = vector.shape_cast %145 : vector<1x128x128xbf16> to vector<128x128xbf16>
    %cst_80 = arith.constant dense<0.000000e+00> : vector<16x128xf32>
    %147 = tpu.matmul %144, %146, %cst_80 {dimension_numbers = #tpu.dot_dimension_numbers<[1], [0], [0], [1], [0, 0, 1, 1], [], []>} : vector<16x128xbf16>, vector<128x128xbf16>, vector<16x128xf32> -> vector<16x128xf32>
    %148 = arith.addf %143, %147 : vector<16x128xf32>
    %149 = vector.extract_strided_slice %134 {offsets = [3, 0], sizes = [16, 128], strides = [1, 1]} : vector<19x128xbf16> to vector<16x128xbf16>
    %c3_81 = arith.constant 3 : index
    %c0_82 = arith.constant 0 : index
    %c0_83 = arith.constant 0 : index
    %150 = vector.load %arg8[%c3_81, %c0_82, %c0_83] : memref<4x128x128xbf16, #tpu.memory_space<vmem>>, vector<1x128x128xbf16>
    %151 = vector.shape_cast %150 : vector<1x128x128xbf16> to vector<128x128xbf16>
    %cst_84 = arith.constant dense<0.000000e+00> : vector<16x128xf32>
    %152 = tpu.matmul %149, %151, %cst_84 {dimension_numbers = #tpu.dot_dimension_numbers<[1], [0], [0], [1], [0, 0, 1, 1], [], []>} : vector<16x128xbf16>, vector<128x128xbf16>, vector<16x128xf32> -> vector<16x128xf32>
    %153 = arith.addf %148, %152 : vector<16x128xf32>
    %c0_85 = arith.constant 0 : index
    %c0_86 = arith.constant 0 : index
    %154 = vector.load %arg9[%c0_85, %c0_86] : memref<1x128xf32, #tpu.memory_space<vmem>>, vector<1x128xf32>
    %155 = vector.broadcast %154 : vector<1x128xf32> to vector<16x128xf32>
    %156 = arith.addf %153, %155 : vector<16x128xf32>
    %c0_87 = arith.constant 0 : index
    %c0_88 = arith.constant 0 : index
    %c0_89 = arith.constant 0 : index
    %157 = vector.load %arg10[%c0_87, %c0_88, %c0_89] : memref<1x16x128xf32, #tpu.memory_space<vmem>>, vector<1x16x128xf32>
    %158 = vector.shape_cast %157 : vector<1x16x128xf32> to vector<16x128xf32>
    %159 = vector.shape_cast %156 : vector<16x128xf32> to vector<1x16x128xf32>
    tpu.vector_store %arg10[%c0_87, %c0_88, %c0_89], %159 {strides = array<i32>} : memref<1x16x128xf32, #tpu.memory_space<vmem>>, vector<1x16x128xf32>,
    return
  }
  func.func @transform_0(%arg0: i32) -> (i32, i32, i32) {
    %c0_i32 = arith.constant 0 : i32
    %c0_i32_0 = arith.constant 0 : i32
    %c0_i32_1 = arith.constant 0 : i32
    return %arg0, %c0_i32, %c0_i32_0 : i32, i32, i32
  }
  func.func @transform_1(%arg0: i32) -> (i32, i32) {
    %c0_i32 = arith.constant 0 : i32
    %c0_i32_0 = arith.constant 0 : i32
    %c0_i32_1 = arith.constant 0 : i32
    return %c0_i32, %c0_i32_0 : i32, i32
  }
  func.func @transform_2(%arg0: i32) -> (i32, i32) {
    %c0_i32 = arith.constant 0 : i32
    %c0_i32_0 = arith.constant 0 : i32
    %c0_i32_1 = arith.constant 0 : i32
    return %c0_i32, %c0_i32_0 : i32, i32
  }
  func.func @transform_3(%arg0: i32) -> (i32, i32, i32) {
    %c0_i32 = arith.constant 0 : i32
    %c0_i32_0 = arith.constant 0 : i32
    %c0_i32_1 = arith.constant 0 : i32
    %c0_i32_2 = arith.constant 0 : i32
    return %c0_i32, %c0_i32_0, %c0_i32_1 : i32, i32, i32
  }
  func.func @transform_4(%arg0: i32) -> (i32, i32) {
    %c0_i32 = arith.constant 0 : i32
    %c0_i32_0 = arith.constant 0 : i32
    %c0_i32_1 = arith.constant 0 : i32
    return %c0_i32, %c0_i32_0 : i32, i32
  }
  func.func @transform_5(%arg0: i32) -> (i32, i32, i32) {
    %c0_i32 = arith.constant 0 : i32
    %c0_i32_0 = arith.constant 0 : i32
    %c0_i32_1 = arith.constant 0 : i32
    %c0_i32_2 = arith.constant 0 : i32
    return %c0_i32, %c0_i32_0, %c0_i32_1 : i32, i32, i32
  }
  func.func @transform_6(%arg0: i32) -> (i32, i32) {
    %c0_i32 = arith.constant 0 : i32
    %c0_i32_0 = arith.constant 0 : i32
    %c0_i32_1 = arith.constant 0 : i32
    return %c0_i32, %c0_i32_0 : i32, i32
  }
  func.func @transform_7(%arg0: i32) -> (i32, i32, i32) {
    %c0_i32 = arith.constant 0 : i32
    %c0_i32_0 = arith.constant 0 : i32
    %c0_i32_1 = arith.constant 0 : i32
    %c0_i32_2 = arith.constant 0 : i32
    return %c0_i32, %c0_i32_0, %c0_i32_1 : i32, i32, i32
  }
  func.func @transform_8(%arg0: i32) -> (i32, i32) {
    %c0_i32 = arith.constant 0 : i32
    %c0_i32_0 = arith.constant 0 : i32
    %c0_i32_1 = arith.constant 0 : i32
    return %c0_i32, %c0_i32_0 : i32, i32
  }
  func.func @transform_9(%arg0: i32) -> (i32, i32, i32) {
    %c0_i32 = arith.constant 0 : i32
    %c0_i32_0 = arith.constant 0 : i32
    %c0_i32_1 = arith.constant 0 : i32
    return %arg0, %c0_i32, %c0_i32_0 : i32, i32, i32
  }
}

</mosaic_0001>

<bundles_post_ra>
// kernel: audio_encoder_forward.2
= control target key start
LH: loop header
LB: loop body
LE: loop exit
PB: predicated region body
PF: predicated region fallthrough
CT: control target
= control target key end

     0   :  { %14 = vsyncpa [#allocation3], 0  ;;  %s2816_s0 = inlined_call_operand.vmem [shape: f32[2,16,128], index: 0, kind: input, shape index: {}]   ;;  %s2817_s1 = inlined_call_operand.hbm [shape: bf16[4,128,128], index: 1, kind: input, shape index: {}]   ;;  %s2818_s2 = inlined_call_operand.vmem [shape: f32[1,128], index: 2, kind: input, shape index: {}]   ;;  %s2819_s3 = inlined_call_operand.hbm [shape: bf16[4,128,128], index: 3, kind: input, shape index: {}]   ;;  %s2820_s4 = inlined_call_operand.vmem [shape: f32[1,128], index: 4, kind: input, shape index: {}]   ;;  %s2821_s5 = inlined_call_operand.hbm [shape: bf16[4,128,128], index: 5, kind: input, shape index: {}]   ;;  %s2822_s6 = inlined_call_operand.vmem [shape: f32[1,128], index: 6, kind: input, shape index: {}]   ;;  %s2823_s7 = inlined_call_operand.vmem [shape: f32[2,7,128], index: 7, kind: output, shape index: {0}]   ;;  %s2824_s8 = inlined_call_operand.vmem [shape: f32[2,2,128], index: 8, kind: output, shape index: {1}]  }
   0x1   :  { %15 = vsyncpa [#allocation5], 0  ;;  %s2596_s27 = smov 0  }
   0x2 LB: > { %s2602_s28 = sadd.s32 4294967295, %s2542_s27   ;;  %p1848_p0 = scmp.ge.s32.totalorder %s2542_s27, 1  ;;  %s2542_s27 = sphi %s2596_s27, %s21_s27  }
   0x3   : > { %p230_p1 = scmp.lt.s32.totalorder %s2542_s27, 3  ;;  %p2333_p2 = scmp.eq.s32.totalorder %s2602_s28, 0 }
   0x4   : > { %s2544_s30 = smov [#allocation4]   ;;  %s2545_s10 = smov [#allocation2]  }
   0x5   : > { %p2607_p3 = pnand %p1848_p0, %p230_p1  ;;  %s258_s9 = sshll.u32 %s2544_s30, 4  ;;  %s259_s9 = int_to_ptr.vmem [resolvable:$true] %s258_s9 }
   0x6   : > { %s242_s11 = sshll.u32 %s2545_s10, 4  ;;  %s2546_s13 = smov [#allocation6]   ;;  %s243_s11 = int_to_ptr.vmem [resolvable:$true] %s242_s11 }
   0x7   : > { %p2323_p4 = pneg %p2607_p3  ;;  %s274_s14 = sshll.u32 %s2546_s13, 4  ;;  %s2619_s14 = int_to_ptr.vmem [resolvable:$true] %s274_s14 }
   0x8   : > { %s2461_s15 = scalar_lea.vmem %s259_s9, 4096  ;;  %p2469_p10 = scmp.lt.s32.totalorder %s259_s9, %s259_s9 }
   0x9   : > { %p2615_p5 = pnand %p2333_p2, %p2323_p4  ;;  %p2462_p7 = scmp.ne.s32.totalorder %s259_s9, %s2461_s15 }
   0xa   : > { %p2470_p11 = scmp.lt.s32.totalorder %s2461_s15, %s2461_s15 }
   0xb   : > { %p2452_p6 = pneg %p2615_p5 }
   0xc   : > { %p2471_p12 = por %p2470_p11, %p2469_p10 }
   0xd   : > { %p2464_p8 = pnand %p2462_p7, %p2452_p6 }
   0xf   : > { %p2465_p9 = pneg %p2464_p8 }
  0x11   : > { %p2472_p13 = pnand %p2471_p12, %p2465_p9 }
  0x13   : > { %2475 = shalt.err (!%p2472_p13)
}
  0x14   : > { %s2547_s16 = smov 64   ;;  %s2548_s17 = smov 4  }
  0x15   : > { %2329 = dma.hbm_to_vmem [thread:$0]  (!%p2615_p5), %s2819_s3, 4096, %s259_s9, [#allocation5], %s2547_s16, %s2547_s16, %s2548_s17  }
  0x16   : > { %s2487_s20 = scalar_lea.vmem %s243_s11, 4096  ;;  %p2495_p7 = scmp.lt.s32.totalorder %s243_s11, %s243_s11 }
  0x17   : > { %p2488_p0 = scmp.ne.s32.totalorder %s243_s11, %s2487_s20  ;;  %p2496_p8 = scmp.lt.s32.totalorder %s2487_s20, %s2487_s20 }
  0x19   : > { %p2490_p1 = pnand %p2488_p0, %p2452_p6  ;;  %p2497_p10 = por %p2496_p8, %p2495_p7 }
  0x1b   : > { %p2491_p4 = pneg %p2490_p1 }
  0x1d   : > { %p2498_p9 = pnand %p2497_p10, %p2491_p4 }
  0x1f   : > { %2501 = shalt.err (!%p2498_p9)
}
  0x20   : > { %2326 = dma.hbm_to_vmem [thread:$0]  (!%p2615_p5), %s2817_s1, 4096, %s243_s11, [#allocation3], %s2547_s16, %s2547_s16, %s2548_s17  }
  0x21   : > { %s2513_s23 = scalar_lea.vmem %s2619_s14, 4096  ;;  %p2521_p0 = scmp.lt.s32.totalorder %s2619_s14, %s2619_s14 }
  0x22   : > { %p2514_p11 = scmp.ne.s32.totalorder %s2619_s14, %s2513_s23  ;;  %p2522_p1 = scmp.lt.s32.totalorder %s2513_s23, %s2513_s23 }
  0x24   : > { %p2516_p12 = pnand %p2514_p11, %p2452_p6  ;;  %p2523_p4 = por %p2522_p1, %p2521_p0 }
  0x26   : > { %p2517_p13 = pneg %p2516_p12 }
  0x28   : > { %p2524_p7 = pnand %p2523_p4, %p2517_p13 }
  0x2a   : > { %2527 = shalt.err (!%p2524_p7)
}
  0x2b   : > { %2332 = dma.hbm_to_vmem [thread:$0]  (!%p2615_p5), %s2821_s5, 4096, %s2619_s14, [#allocation5], %s2547_s16, %s2547_s16, %s2548_s17  }
  0x2c   : > { %301 = sbr.rel (%p2607_p3) target bundleno = 820 (0x334), region = 48 }
  0x31   : > { %2533 = dma.done.wait (%p2333_p2), [#allocation3], 4096  }
  0x32   : > { %2535 = vsyncadd (%p2333_p2), [#allocation3], 4294963200 }
  0x33   : > { %2537 = dma.done.wait (%p2333_p2), [#allocation5], 8192  }
  0x34   : > { %2539 = vsyncadd (%p2333_p2), [#allocation5], 4294959104  ;;  %v2549_v0 = vmov 0.0   ;;  %vm2550_vm0 = vmmov 0   ;;  %v2354_v1 = vld [vmem:[#allocation2 + $0x78] sm:$0xff]   ;;  %v2356_v3 = vld [vmem:[#allocation2 + $0x70] sm:$0xff]  }
  0x35   : > { %2071 = vmatprep.subr.bf16.mxu0 %v2549_v0  ;;  %2091 = vmatprep.subr.bf16.mxu1 %v2549_v0  ;;  %v2355_v2 = vld [vmem:[#allocation2 + $0x38] sm:$0xff]   ;;  %p346_p3 = scmp.lt.s32.totalorder %s2602_s28, 1  ;;  %v2357_v4 = vld [vmem:[#allocation2 + $0x30] sm:$0xff]   ;;  %v2358_v5 = vld [vmem:[#allocation2 + $0x68] sm:$0xff]   ;;  %vm1712_vm1 = vcmask 1046528   ;;  %vm1728_vm2 = vcmask 1040384  }
  0x36   : > { %2087 = vmatprep.mubr.msk.bf16.mxu0 %vm2550_vm0, %v2549_v0  ;;  %2107 = vmatprep.mubr.msk.bf16.mxu1 %vm2550_vm0, %v2549_v0  ;;  %v2359_v6 = vld [vmem:[#allocation2 + $0x28] sm:$0xff]   ;;  %v2360_v7 = vld [vmem:[#allocation2 + $0x60] sm:$0xff]   ;;  %v2362_v9 = vld [vmem:[#allocation2 + $0x58] sm:$0xff]  }
  0x37   : > { %2072 = vmatpush3.bf16.msra.mxu0 %v2354_v1  ;;  %2092 = vmatpush3.bf16.msra.mxu1 %v2355_v2  ;;  %s2828_s28 = smov (!%p346_p3, %s2602_s28), 1  ;;  %v2361_v8 = vld [vmem:[#allocation2 + $0x20] sm:$0xff]   ;;  %v2363_v10 = vld [vmem:[#allocation2 + $0x18] sm:$0xff]   ;;  %v2364_v14 = vld [vmem:[#allocation2 + $0x50] sm:$0xff]  }
  0x38   : > { %2073 = vmatprep.subr.bf16.mxu0 %v2549_v0  ;;  %2093 = vmatprep.subr.bf16.mxu1 %v2549_v0  ;;  %s1962_s26 = sshll.u32 %s2828_s28, 4  ;;  %v2365_v15 = vld [vmem:[#allocation2 + $0x10] sm:$0xff]   ;;  %v2366_v16 = vld [vmem:[#allocation2 + $0x48] sm:$0xff]   ;;  %v2368_v21 = vld [vmem:[#allocation2 + $0x40] sm:$0xff]   ;;  %s1859_s14 = sshll.u32 %s2828_s28, 3 }
  0x39   : > { %s350_s9 = scalar_lea.vmem %s2816_s0, %s1962_s26  ;;  %v2367_v18 = vld [vmem:[#allocation2 + $0x8] sm:$0xff]   ;;  %v2369_v22 = vld [vmem:[#allocation2] sm:$0xff]   ;;  %v2370_v24 = vld [vmem:[#allocation2 + $0xb8] sm:$0xff]   ;;  %s354_s19 = scalar_lea.vmem %s2823_s7, %s1859_s14 }
  0x3a   : > { %v360_v11 = vld [vmem:[%s350_s9] sm:$0xff]  ;;  %v361_v12 = vld [vmem:[%s350_s9 + $0x8] sm:$0xff]  ;;  %v2371_v26 = vld [vmem:[#allocation2 + $0xf8] sm:$0xff]   ;;  %s1860_s20 = sshll.u32 %s2828_s28, 1 }
  0x3b   : > { %2074 = vmatpush3.bf16.msra.mxu0 %v2356_v3  ;;  %2094 = vmatpush3.bf16.msra.mxu1 %v2357_v4  ;;  %v2684_v13 = vpack.c.bf16 %v361_v12, %v360_v11  ;;  %v2372_v27 = vld [vmem:[#allocation2 + $0xb0] sm:$0xff]   ;;  %v2374_v31 = vld [vmem:[#allocation2 + $0xa8] sm:$0xff]   ;;  %v2376_v33 = vld [vmem:[#allocation2 + $0xa0] sm:$0xff]   ;;  %s358_s23 = scalar_lea.vmem %s2824_s8, %s1860_s20 }
  0x3c   : > { %2075 = vmatprep.subr.bf16.mxu0 %v2549_v0  ;;  %2095 = vmatprep.subr.bf16.mxu1 %v2549_v0  ;;  %v2373_v30 = vld [vmem:[#allocation2 + $0xf0] sm:$0xff]   ;;  %v2375_v32 = vld [vmem:[#allocation2 + $0xe8] sm:$0xff]   ;;  %v2377_v34 = vld [vmem:[#allocation2 + $0xe0] sm:$0xff]  }
  0x3d   : > { %v399_v17 = vshll.u32 %v2684_v13, 16  ;;  %v397_v19 = vshrl.u32 %v2684_v13, 16  ;;  %v600_v28 = vrot.slane %v2684_v13, 1  ;;  %v2378_v35 = vld [vmem:[#allocation2 + $0x98] sm:$0xff]   ;;  %v2380_v37 = vld [vmem:[#allocation2 + $0x90] sm:$0xff]   ;;  %v2382_v39 = vld [vmem:[#allocation2 + $0x88] sm:$0xff]  }
  0x3e   : > { %v2379_v36 = vld [vmem:[#allocation2 + $0xd8] sm:$0xff]   ;;  %v2381_v38 = vld [vmem:[#allocation2 + $0xd0] sm:$0xff]   ;;  %v2383_v40 = vld [vmem:[#allocation2 + $0xc8] sm:$0xff]  }
  0x3f   : > { %2076 = vmatpush3.bf16.msra.mxu0 %v2358_v5  ;;  %2096 = vmatpush3.bf16.msra.mxu1 %v2359_v6  ;;  %v401_v20 = vrot.slane %v399_v17, 1  ;;  %v710_v25 = vrot.slane %v397_v19, 1  ;;  %v711_v29 = vrot.slane %v399_v17, 2  ;;  %v2384_v41 = vld [vmem:[#allocation2 + $0x80] sm:$0xff]   ;;  %v2386_v44 = vld [vmem:[#allocation4 + $0x38] sm:$0xff]   ;;  %v2387_v46 = vld [vmem:[#allocation4 + $0x30] sm:$0xff]  }
  0x40   : > { %2077 = vmatprep.subr.bf16.mxu0 %v2549_v0  ;;  %2097 = vmatprep.subr.bf16.mxu1 %v2549_v0  ;;  %v2385_v42 = vld [vmem:[#allocation2 + $0xc0] sm:$0xff]   ;;  %v2388_v45 = vld [vmem:[#allocation4 + $0x78] sm:$0xff]   ;;  %v2390_v47 = vld [vmem:[#allocation4 + $0x70] sm:$0xff]  }
  0x41   : > { %v402_v23 = vor.u32 %v401_v20, %v397_v19  ;;  %v712_v43 = vor.u32 %v711_v29, %v710_v25  ;;  %v2389_v48 = vld [vmem:[#allocation4 + $0x28] sm:$0xff]   ;;  %v2391_v50 = vld [vmem:[#allocation4 + $0x20] sm:$0xff]   ;;  %v2393_v52 = vld [vmem:[#allocation4 + $0x18] sm:$0xff]  }
  0x42   : > { %v2392_v49 = vld [vmem:[#allocation4 + $0x68] sm:$0xff]   ;;  %v2394_v51 = vld [vmem:[#allocation4 + $0x60] sm:$0xff]   ;;  %v2395_v53 = vld [vmem:[#allocation4 + $0x10] sm:$0xff]  }
  0x43   : > { %2078 = vmatpush3.bf16.msra.mxu0 %v2360_v7  ;;  %2098 = vmatpush3.bf16.msra.mxu1 %v2361_v8  ;;  %v2396_v54 = vld [vmem:[#allocation4 + $0x58] sm:$0xff]   ;;  %v2397_v55 = vld [vmem:[#allocation4 + $0x8] sm:$0xff]   ;;  %v2398_v56 = vld [vmem:[#allocation4 + $0x50] sm:$0xff]  }
  0x44   : > { %2079 = vmatprep.subr.bf16.mxu0 %v2549_v0  ;;  %2099 = vmatprep.subr.bf16.mxu1 %v2549_v0  ;;  %v2399_v57 = vld [vmem:[#allocation4] sm:$0xff]   ;;  %v2400_v58 = vld [vmem:[#allocation4 + $0x48] sm:$0xff]   ;;  %v2403_v25 = vld [vmem:[#allocation4 + $0xf0] sm:$0xff]  }
  0x45   : > { %v2402_v59 = vld [vmem:[#allocation4 + $0x40] sm:$0xff]  }
  0x47   : > { %2080 = vmatpush3.bf16.msra.mxu0 %v2362_v9  ;;  %2100 = vmatpush3.bf16.msra.mxu1 %v2363_v10 }
  0x48   : > { %2081 = vmatprep.subr.bf16.mxu0 %v2549_v0  ;;  %2101 = vmatprep.subr.bf16.mxu1 %v2549_v0 }
  0x4b   : > { %2082 = vmatpush3.bf16.msra.mxu0 %v2364_v14  ;;  %2102 = vmatpush3.bf16.msra.mxu1 %v2365_v15 }
  0x4c   : > { %2083 = vmatprep.subr.bf16.mxu0 %v2549_v0  ;;  %2103 = vmatprep.subr.bf16.mxu1 %v2549_v0 }
  0x4f   : > { %2084 = vmatpush3.bf16.msra.mxu0 %v2366_v16  ;;  %2104 = vmatpush3.bf16.msra.mxu1 %v2367_v18  ;;  %v1893_v16 = vld [vmem:[%s2818_s2] ss:$0 sm:$0xff] }
  0x50   : > { %2085 = vmatprep.subr.bf16.mxu0 %v2549_v0  ;;  %2105 = vmatprep.subr.bf16.mxu1 %v2549_v0 }
  0x53   : > { %2086 = vmatpush3.bf16.msra.mxu0 %v2368_v21  ;;  %2106 = vmatpush3.bf16.msra.mxu1 %v2369_v22  ;;  %v2401_v22 = vld [vmem:[#allocation4 + $0xf8] sm:$0xff]  }
  0x54   : > { %2111 = vmatprep.subr.bf16.mxu0 %v2549_v0  ;;  %2131 = vmatprep.subr.bf16.mxu1 %v2549_v0 }
  0x56   : > { %2088 = vmatmul.mubr.bf16.vlgmr.msra.gmra.mxu0 %v402_v23  ;;  %2108 = vmatmul.mubr.bf16.vlgmr.msra.gmra.mxu1 %v2684_v13 }
  0x57   : > { %2112 = vmatpush3.bf16.msra.mxu0 %v2370_v24  ;;  %2132 = vmatpush3.bf16.msra.mxu1 %v2371_v26 }
  0x58   : > { %2113 = vmatprep.subr.bf16.mxu0 %v2549_v0  ;;  %2133 = vmatprep.subr.bf16.mxu1 %v2549_v0 }
  0x59   : > { %2127 = vmatprep.mubr.msk.bf16.mxu0 %vm2550_vm0, %v2549_v0  ;;  %2147 = vmatprep.mubr.msk.bf16.mxu1 %vm2550_vm0, %v2549_v0 }
  0x5b   : > { %2114 = vmatpush3.bf16.msra.mxu0 %v2372_v27  ;;  %2134 = vmatpush3.bf16.msra.mxu1 %v2373_v30  ;;  %v2405_v30 = vld [vmem:[#allocation4 + $0xe8] sm:$0xff]  }
  0x5c   : > { %2115 = vmatprep.subr.bf16.mxu0 %v2549_v0  ;;  %2135 = vmatprep.subr.bf16.mxu1 %v2549_v0 }
  0x5f   : > { %2116 = vmatpush3.bf16.msra.mxu0 %v2374_v31  ;;  %2136 = vmatpush3.bf16.msra.mxu1 %v2375_v32  ;;  %v2406_v31 = vld [vmem:[#allocation4 + $0xb0] sm:$0xff]   ;;  %v2407_v32 = vld [vmem:[#allocation4 + $0xe0] sm:$0xff]  }
  0x60   : > { %2117 = vmatprep.subr.bf16.mxu0 %v2549_v0  ;;  %2137 = vmatprep.subr.bf16.mxu1 %v2549_v0 }
  0x63   : > { %2118 = vmatpush3.bf16.msra.mxu0 %v2376_v33  ;;  %2138 = vmatpush3.bf16.msra.mxu1 %v2377_v34  ;;  %v2408_v33 = vld [vmem:[#allocation4 + $0xa8] sm:$0xff]   ;;  %v2409_v34 = vld [vmem:[#allocation4 + $0xd8] sm:$0xff]  }
  0x64   : > { %2119 = vmatprep.subr.bf16.mxu0 %v2549_v0  ;;  %2139 = vmatprep.subr.bf16.mxu1 %v2549_v0 }
  0x67   : > { %2120 = vmatpush3.bf16.msra.mxu0 %v2378_v35  ;;  %2140 = vmatpush3.bf16.msra.mxu1 %v2379_v36  ;;  %v2410_v35 = vld [vmem:[#allocation4 + $0xa0] sm:$0xff]   ;;  %v2411_v36 = vld [vmem:[#allocation4 + $0xd0] sm:$0xff]  }
  0x68   : > { %2121 = vmatprep.subr.bf16.mxu0 %v2549_v0  ;;  %2141 = vmatprep.subr.bf16.mxu1 %v2549_v0 }
  0x6b   : > { %2122 = vmatpush3.bf16.msra.mxu0 %v2380_v37  ;;  %2142 = vmatpush3.bf16.msra.mxu1 %v2381_v38  ;;  %v2412_v37 = vld [vmem:[#allocation4 + $0x98] sm:$0xff]   ;;  %v2413_v38 = vld [vmem:[#allocation4 + $0xc8] sm:$0xff]  }
  0x6c   : > { %2123 = vmatprep.subr.bf16.mxu0 %v2549_v0  ;;  %2143 = vmatprep.subr.bf16.mxu1 %v2549_v0 }
  0x6f   : > { %2124 = vmatpush3.bf16.msra.mxu0 %v2382_v39  ;;  %2144 = vmatpush3.bf16.msra.mxu1 %v2383_v40  ;;  %v2414_v39 = vld [vmem:[#allocation4 + $0x90] sm:$0xff]   ;;  %v2415_v40 = vld [vmem:[#allocation4 + $0xc0] sm:$0xff]  }
  0x70   : > { %2125 = vmatprep.subr.bf16.mxu0 %v2549_v0  ;;  %2145 = vmatprep.subr.bf16.mxu1 %v2549_v0 }
  0x73   : > { %2126 = vmatpush3.bf16.msra.mxu0 %v2384_v41  ;;  %2146 = vmatpush3.bf16.msra.mxu1 %v2385_v42 }
  0x74   : > { %2151 = vmatprep.subr.bf16.mxu0 %v2549_v0  ;;  %2171 = vmatprep.subr.bf16.mxu1 %v2549_v0 }
  0x76   : > { %2128 = vmatmul.mubr.bf16.vlgmr.msra.gmra.mxu0 %v600_v28  ;;  %2148 = vmatmul.mubr.bf16.vlgmr.msra.gmra.mxu1 %v712_v43  ;;  %v2404_v28 = vld [vmem:[#allocation4 + $0xb8] sm:$0xff]   ;;  %v2416_v43 = vld [vmem:[#allocation4 + $0x88] sm:$0xff]  }
  0x77   : > { %2167 = vmatprep.mubr.msk.bf16.mxu0 %vm2550_vm0, %v2549_v0  ;;  %2187 = vmatprep.mubr.msk.bf16.mxu1 %vm2550_vm0, %v2549_v0 }
  0x78   : > { %2172 = vmatpush3.bf16.msra.mxu1 %v2386_v44  ;;  %2152 = vmatpush3.bf16.msra.mxu0 %v2388_v45  ;;  %v2417_v45 = vld [vmem:[#allocation4 + $0x80] sm:$0xff]  }
  0x79   : > { %2173 = vmatprep.subr.bf16.mxu1 %v2549_v0  ;;  %2153 = vmatprep.subr.bf16.mxu0 %v2549_v0 }
  0x7c   : > { %2174 = vmatpush3.bf16.msra.mxu1 %v2387_v46  ;;  %2154 = vmatpush3.bf16.msra.mxu0 %v2390_v47  ;;  %v2418_v47 = vld [vmem:[#allocation6 + $0x38] sm:$0xff]  }
  0x7d   : > { %2175 = vmatprep.subr.bf16.mxu1 %v2549_v0  ;;  %2155 = vmatprep.subr.bf16.mxu0 %v2549_v0 }
  0x80   : > { %2176 = vmatpush3.bf16.msra.mxu1 %v2389_v48  ;;  %2156 = vmatpush3.bf16.msra.mxu0 %v2392_v49  ;;  %v2420_v48 = vld [vmem:[#allocation6 + $0x78] sm:$0xff]   ;;  %v2419_v49 = vld [vmem:[#allocation6 + $0x30] sm:$0xff]  }
  0x81   : > { %2177 = vmatprep.subr.bf16.mxu1 %v2549_v0  ;;  %2157 = vmatprep.subr.bf16.mxu0 %v2549_v0 }
  0x84   : > { %2178 = vmatpush3.bf16.msra.mxu1 %v2391_v50  ;;  %2158 = vmatpush3.bf16.msra.mxu0 %v2394_v51  ;;  %v2422_v50 = vld [vmem:[#allocation6 + $0x70] sm:$0xff]   ;;  %v2421_v51 = vld [vmem:[#allocation6 + $0x28] sm:$0xff]  }
  0x85   : > { %2179 = vmatprep.subr.bf16.mxu1 %v2549_v0  ;;  %2159 = vmatprep.subr.bf16.mxu0 %v2549_v0 }
  0x88   : > { %2180 = vmatpush3.bf16.msra.mxu1 %v2393_v52  ;;  %2160 = vmatpush3.bf16.msra.mxu0 %v2396_v54  ;;  %v2423_v52 = vld [vmem:[#allocation6 + $0x20] sm:$0xff]   ;;  %v2425_v54 = vld [vmem:[#allocation6 + $0x18] sm:$0xff]  }
  0x89   : > { %2181 = vmatprep.subr.bf16.mxu1 %v2549_v0  ;;  %2161 = vmatprep.subr.bf16.mxu0 %v2549_v0 }
  0x8c   : > { %2182 = vmatpush3.bf16.msra.mxu1 %v2395_v53  ;;  %2162 = vmatpush3.bf16.msra.mxu0 %v2398_v56  ;;  %v2424_v53 = vld [vmem:[#allocation6 + $0x68] sm:$0xff]   ;;  %v2427_v56 = vld [vmem:[#allocation6 + $0x10] sm:$0xff]  }
  0x8d   : > { %2183 = vmatprep.subr.bf16.mxu1 %v2549_v0  ;;  %2163 = vmatprep.subr.bf16.mxu0 %v2549_v0 }
  0x90   : > { %2184 = vmatpush3.bf16.msra.mxu1 %v2397_v55  ;;  %2164 = vmatpush3.bf16.msra.mxu0 %v2400_v58  ;;  %v2426_v55 = vld [vmem:[#allocation6 + $0x60] sm:$0xff]   ;;  %v2429_v58 = vld [vmem:[#allocation6 + $0x8] sm:$0xff]  }
  0x91   : > { %2185 = vmatprep.subr.bf16.mxu1 %v2549_v0  ;;  %2165 = vmatprep.subr.bf16.mxu0 %v2549_v0 }
  0x94   : > { %2186 = vmatpush3.bf16.msra.mxu1 %v2399_v57  ;;  %2166 = vmatpush3.bf16.msra.mxu0 %v2402_v59  ;;  %v2428_v57 = vld [vmem:[#allocation6 + $0x58] sm:$0xff]   ;;  %v2430_v59 = vld [vmem:[#allocation6 + $0x50] sm:$0xff]  }
  0x95   : > { %2211 = vmatprep.subr.bf16.mxu1 %v2549_v0  ;;  %2191 = vmatprep.subr.bf16.mxu0 %v2549_v0 }
 0x116   : > { %v486_v60 = vpop.f32.mrf.mxu0  ;;  %v575_v61 = vpop.f32.mrf.mxu1 }
 0x117   : > { %v576_v5 = vadd.f32 %v575_v61, %v486_v60  ;;  %v2431_v60 = vld [vmem:[#allocation6] sm:$0xff]   ;;  %v2432_v61 = vld [vmem:[#allocation6 + $0x48] sm:$0xff]  }
 0x118   : > { %v2089_v62 = vpop.f32.mrf.mxu0  ;;  %v2109_v63 = vpop.f32.mrf.mxu1 }
 0x119   : > { %v2434_v62 = vld [vmem:[#allocation6 + $0x40] sm:$0xff]  }
 0x11a   : > { %v489_v1 = vpop.f32.mrf.mxu0  ;;  %v578_v2 = vpop.f32.mrf.mxu1 }
 0x11b   : > { %v579_v10 = vadd.f32 %v578_v2, %v489_v1 }
 0x11c   : > { %v2090_v3 = vpop.f32.mrf.mxu0  ;;  %v2110_v4 = vpop.f32.mrf.mxu1 }
 0x136   : > { %v684_v6 = vpop.f32.mrf.mxu0  ;;  %v796_v8 = vpop.f32.mrf.mxu1 }
 0x137   : > { %v691_v7 = vadd.f32 %v684_v6, %v576_v5 }
 0x138   : > { %v2129_v9 = vpop.f32.mrf.mxu0  ;;  %v2149_v11 = vpop.f32.mrf.mxu1 }
 0x139   : > { %v803_v13 = vadd.f32 %v796_v8, %v691_v7 }
 0x13a   : > { %v687_v12 = vpop.f32.mrf.mxu0  ;;  %v799_v15 = vpop.f32.mrf.mxu1 }
 0x13b   : > { %v692_v14 = vadd.f32 %v687_v12, %v579_v10  ;;  %v812_v20 = vadd.f32 %v1893_v16, %v803_v13 }
 0x13c   : > { %v2130_v17 = vpop.f32.mrf.mxu0  ;;  %v2150_v19 = vpop.f32.mrf.mxu1 }
 0x13d   : > { %v804_v18 = vadd.f32 %v799_v15, %v692_v14 }
 0x13f   : > { %v813_v21 = vadd.f32 %v1893_v16, %v804_v18 }
 0x141   : > { %v814_v23 = vpack.c.bf16 %v813_v21, %v812_v20  ;;  %v1926_v20 = vld [vmem:[%s2820_s4] ss:$0 sm:$0xff] }
 0x143   : > { %2188 = vmatmul.mubr.bf16.vlgmr.msra.gmra.mxu1 %v814_v23  ;;  %v851_v24 = vshll.u32 %v814_v23, 16  ;;  %v849_v26 = vshrl.u32 %v814_v23, 16  ;;  %v1052_v46 = vrot.slane %v814_v23, 1 }
 0x144   : > { %2212 = vmatpush3.bf16.msra.mxu1 %v2401_v22  ;;  %2227 = vmatprep.mubr.msk.bf16.mxu1 %vm2550_vm0, %v2549_v0 }
 0x145   : > { %2213 = vmatprep.subr.bf16.mxu1 %v2549_v0  ;;  %v853_v27 = vrot.slane %v851_v24, 1  ;;  %v1162_v41 = vrot.slane %v849_v26, 1  ;;  %v1163_v42 = vrot.slane %v851_v24, 2 }
 0x147   : > { %v854_v29 = vor.u32 %v853_v27, %v849_v26  ;;  %v1164_v44 = vor.u32 %v1163_v42, %v1162_v41  ;;  %v2445_v41 = vld [vmem:[#allocation6 + $0xc8] sm:$0xff]   ;;  %v2446_v42 = vld [vmem:[#allocation6 + $0x90] sm:$0xff]  }
 0x148   : > { %2214 = vmatpush3.bf16.msra.mxu1 %v2403_v25  ;;  %v2433_v25 = vld [vmem:[#allocation6 + $0xf8] sm:$0xff]  }
 0x149   : > { %2168 = vmatmul.mubr.bf16.vlgmr.msra.gmra.mxu0 %v854_v29  ;;  %2215 = vmatprep.subr.bf16.mxu1 %v2549_v0 }
 0x14a   : > { %2192 = vmatpush3.bf16.msra.mxu0 %v2404_v28  ;;  %2207 = vmatprep.mubr.msk.bf16.mxu0 %vm2550_vm0, %v2549_v0  ;;  %v2435_v28 = vld [vmem:[#allocation6 + $0xf0] sm:$0xff]  }
 0x14b   : > { %2193 = vmatprep.subr.bf16.mxu0 %v2549_v0 }
 0x14c   : > { %2216 = vmatpush3.bf16.msra.mxu1 %v2405_v30 }
 0x14d   : > { %2217 = vmatprep.subr.bf16.mxu1 %v2549_v0 }
 0x14e   : > { %2194 = vmatpush3.bf16.msra.mxu0 %v2406_v31  ;;  %v2436_v31 = vld [vmem:[#allocation6 + $0xb8] sm:$0xff]  }
 0x14f   : > { %2195 = vmatprep.subr.bf16.mxu0 %v2549_v0 }
 0x150   : > { %2218 = vmatpush3.bf16.msra.mxu1 %v2407_v32 }
 0x151   : > { %2219 = vmatprep.subr.bf16.mxu1 %v2549_v0 }
 0x152   : > { %2196 = vmatpush3.bf16.msra.mxu0 %v2408_v33  ;;  %v2437_v33 = vld [vmem:[#allocation6 + $0xe8] sm:$0xff]  }
 0x153   : > { %2197 = vmatprep.subr.bf16.mxu0 %v2549_v0 }
 0x154   : > { %2220 = vmatpush3.bf16.msra.mxu1 %v2409_v34  ;;  %v2438_v34 = vld [vmem:[#allocation6 + $0xb0] sm:$0xff]  }
 0x155   : > { %2221 = vmatprep.subr.bf16.mxu1 %v2549_v0 }
 0x156   : > { %2198 = vmatpush3.bf16.msra.mxu0 %v2410_v35  ;;  %v2439_v35 = vld [vmem:[#allocation6 + $0xe0] sm:$0xff]  }
 0x157   : > { %2199 = vmatprep.subr.bf16.mxu0 %v2549_v0 }
 0x158   : > { %2222 = vmatpush3.bf16.msra.mxu1 %v2411_v36  ;;  %v2440_v36 = vld [vmem:[#allocation6 + $0xa8] sm:$0xff]  }
 0x159   : > { %2223 = vmatprep.subr.bf16.mxu1 %v2549_v0 }
 0x15a   : > { %2200 = vmatpush3.bf16.msra.mxu0 %v2412_v37  ;;  %v2441_v37 = vld [vmem:[#allocation6 + $0xd8] sm:$0xff]  }
 0x15b   : > { %2201 = vmatprep.subr.bf16.mxu0 %v2549_v0 }
 0x15c   : > { %2224 = vmatpush3.bf16.msra.mxu1 %v2413_v38  ;;  %v2442_v38 = vld [vmem:[#allocation6 + $0xa0] sm:$0xff]  }
 0x15d   : > { %2225 = vmatprep.subr.bf16.mxu1 %v2549_v0 }
 0x15e   : > { %2202 = vmatpush3.bf16.msra.mxu0 %v2414_v39  ;;  %v2443_v39 = vld [vmem:[#allocation6 + $0xd0] sm:$0xff]  }
 0x15f   : > { %2203 = vmatprep.subr.bf16.mxu0 %v2549_v0 }
 0x160   : > { %2226 = vmatpush3.bf16.msra.mxu1 %v2415_v40  ;;  %v2444_v40 = vld [vmem:[#allocation6 + $0x98] sm:$0xff]  }
 0x161   : > { %2251 = vmatprep.subr.bf16.mxu1 %v2549_v0 }
 0x162   : > { %2204 = vmatpush3.bf16.msra.mxu0 %v2416_v43  ;;  %v2447_v43 = vld [vmem:[#allocation6 + $0xc0] sm:$0xff]  }
 0x163   : > { %2228 = vmatmul.mubr.bf16.vlgmr.msra.gmra.mxu1 %v1164_v44  ;;  %2205 = vmatprep.subr.bf16.mxu0 %v2549_v0 }
 0x164   : > { %2267 = vmatprep.mubr.msk.bf16.mxu1 %vm2550_vm0, %v2549_v0  ;;  %2252 = vmatpush3.bf16.msra.mxu1 %v2418_v47 }
 0x165   : > { %2253 = vmatprep.subr.bf16.mxu1 %v2549_v0 }
 0x166   : > { %2206 = vmatpush3.bf16.msra.mxu0 %v2417_v45 }
 0x167   : > { %2231 = vmatprep.subr.bf16.mxu0 %v2549_v0 }
 0x168   : > { %2254 = vmatpush3.bf16.msra.mxu1 %v2419_v49 }
 0x169   : > { %2208 = vmatmul.mubr.bf16.vlgmr.msra.gmra.mxu0 %v1052_v46  ;;  %2255 = vmatprep.subr.bf16.mxu1 %v2549_v0  ;;  %v2448_v46 = vld [vmem:[#allocation6 + $0x88] sm:$0xff]  }
 0x16a   : > { %2247 = vmatprep.mubr.msk.bf16.mxu0 %vm2550_vm0, %v2549_v0  ;;  %2232 = vmatpush3.bf16.msra.mxu0 %v2420_v48  ;;  %v2449_v48 = vld [vmem:[#allocation6 + $0x80] sm:$0xff]  }
 0x16b   : > { %2233 = vmatprep.subr.bf16.mxu0 %v2549_v0 }
 0x16c   : > { %2256 = vmatpush3.bf16.msra.mxu1 %v2421_v51 }
 0x16d   : > { %2257 = vmatprep.subr.bf16.mxu1 %v2549_v0 }
 0x16e   : > { %2234 = vmatpush3.bf16.msra.mxu0 %v2422_v50 }
 0x16f   : > { %2235 = vmatprep.subr.bf16.mxu0 %v2549_v0 }
 0x170   : > { %2258 = vmatpush3.bf16.msra.mxu1 %v2423_v52 }
 0x171   : > { %2259 = vmatprep.subr.bf16.mxu1 %v2549_v0 }
 0x172   : > { %2236 = vmatpush3.bf16.msra.mxu0 %v2424_v53 }
 0x173   : > { %2237 = vmatprep.subr.bf16.mxu0 %v2549_v0 }
 0x174   : > { %2260 = vmatpush3.bf16.msra.mxu1 %v2425_v54 }
 0x175   : > { %2261 = vmatprep.subr.bf16.mxu1 %v2549_v0 }
 0x176   : > { %2238 = vmatpush3.bf16.msra.mxu0 %v2426_v55 }
 0x177   : > { %2239 = vmatprep.subr.bf16.mxu0 %v2549_v0 }
 0x178   : > { %2262 = vmatpush3.bf16.msra.mxu1 %v2427_v56 }
 0x179   : > { %2263 = vmatprep.subr.bf16.mxu1 %v2549_v0 }
 0x17a   : > { %2240 = vmatpush3.bf16.msra.mxu0 %v2428_v57 }
 0x17b   : > { %2241 = vmatprep.subr.bf16.mxu0 %v2549_v0 }
 0x17c   : > { %2264 = vmatpush3.bf16.msra.mxu1 %v2429_v58 }
 0x17d   : > { %2265 = vmatprep.subr.bf16.mxu1 %v2549_v0 }
 0x17e   : > { %2242 = vmatpush3.bf16.msra.mxu0 %v2430_v59 }
 0x17f   : > { %2243 = vmatprep.subr.bf16.mxu0 %v2549_v0 }
 0x180   : > { %2266 = vmatpush3.bf16.msra.mxu1 %v2431_v60 }
 0x181   : > { %2291 = vmatprep.subr.bf16.mxu1 %v2549_v0 }
 0x182   : > { %2244 = vmatpush3.bf16.msra.mxu0 %v2432_v61 }
 0x183   : > { %2245 = vmatprep.subr.bf16.mxu0 %v2549_v0 }
 0x186   : > { %2246 = vmatpush3.bf16.msra.mxu0 %v2434_v62 }
 0x187   : > { %2271 = vmatprep.subr.bf16.mxu0 %v2549_v0 }
 0x203   : > { %v1027_v63 = vpop.f32.mrf.mxu1 }
 0x205   : > { %v2189_v1 = vpop.f32.mrf.mxu1 }
 0x206   : > { %v1959_v1 = vld [vmem:[%s2822_s6] ss:$0 sm:$0xff] }
 0x207   : > { %v1030_v2 = vpop.f32.mrf.mxu1 }
 0x209   : > { %v938_v3 = vpop.f32.mrf.mxu0  ;;  %v2190_v4 = vpop.f32.mrf.mxu1 }
 0x20a   : > { %v1028_v11 = vadd.f32 %v1027_v63, %v938_v3 }
 0x20b   : > { %v2169_v5 = vpop.f32.mrf.mxu0 }
 0x20d   : > { %v941_v6 = vpop.f32.mrf.mxu0 }
 0x20e   : > { %v1031_v16 = vadd.f32 %v1030_v2, %v941_v6 }
 0x20f   : > { %v2170_v7 = vpop.f32.mrf.mxu0 }
 0x223   : > { %v1248_v8 = vpop.f32.mrf.mxu1 }
 0x225   : > { %v2229_v9 = vpop.f32.mrf.mxu1 }
 0x227   : > { %v1251_v10 = vpop.f32.mrf.mxu1 }
 0x229   : > { %v1136_v12 = vpop.f32.mrf.mxu0  ;;  %v2230_v13 = vpop.f32.mrf.mxu1 }
 0x22a   : > { %v1143_v14 = vadd.f32 %v1136_v12, %v1028_v11 }
 0x22b   : > { %v2209_v15 = vpop.f32.mrf.mxu0 }
 0x22c   : > { %v1255_v18 = vadd.f32 %v1248_v8, %v1143_v14 }
 0x22d   : > { %v1139_v17 = vpop.f32.mrf.mxu0 }
 0x22e   : > { %v1144_v19 = vadd.f32 %v1139_v17, %v1031_v16  ;;  %v1264_v23 = vadd.f32 %v1926_v20, %v1255_v18 }
 0x22f   : > { %v2210_v21 = vpop.f32.mrf.mxu0 }
 0x230   : > { %v1256_v22 = vadd.f32 %v1251_v10, %v1144_v19 }
 0x232   : > { %v1265_v24 = vadd.f32 %v1926_v20, %v1256_v22 }
 0x234   : > { %v1266_v26 = vpack.c.bf16 %v1265_v24, %v1264_v23 }
 0x236   : > { %2268 = vmatmul.mubr.bf16.vlgmr.msra.gmra.mxu1 %v1266_v26  ;;  %v1303_v27 = vshll.u32 %v1266_v26, 16  ;;  %v1301_v29 = vshrl.u32 %v1266_v26, 16  ;;  %v1502_v49 = vrot.slane %v1266_v26, 1 }
 0x237   : > { %2292 = vmatpush3.bf16.msra.mxu1 %v2433_v25  ;;  %2307 = vmatprep.mubr.msk.bf16.mxu1 %vm2550_vm0, %v2549_v0 }
 0x238   : > { %2293 = vmatprep.subr.bf16.mxu1 %v2549_v0  ;;  %v1305_v30 = vrot.slane %v1303_v27, 1  ;;  %v1610_v44 = vrot.slane %v1301_v29, 1  ;;  %v1611_v45 = vrot.slane %v1303_v27, 2 }
 0x23a   : > { %v1306_v32 = vor.u32 %v1305_v30, %v1301_v29  ;;  %v1612_v47 = vor.u32 %v1611_v45, %v1610_v44 }
 0x23b   : > { %2294 = vmatpush3.bf16.msra.mxu1 %v2435_v28 }
 0x23c   : > { %2248 = vmatmul.mubr.bf16.vlgmr.msra.gmra.mxu0 %v1306_v32  ;;  %2295 = vmatprep.subr.bf16.mxu1 %v2549_v0 }
 0x23d   : > { %2272 = vmatpush3.bf16.msra.mxu0 %v2436_v31  ;;  %2287 = vmatprep.mubr.msk.bf16.mxu0 %vm2550_vm0, %v2549_v0 }
 0x23e   : > { %2273 = vmatprep.subr.bf16.mxu0 %v2549_v0 }
 0x23f   : > { %2296 = vmatpush3.bf16.msra.mxu1 %v2437_v33 }
 0x240   : > { %2297 = vmatprep.subr.bf16.mxu1 %v2549_v0 }
 0x241   : > { %2274 = vmatpush3.bf16.msra.mxu0 %v2438_v34 }
 0x242   : > { %2275 = vmatprep.subr.bf16.mxu0 %v2549_v0 }
 0x243   : > { %2298 = vmatpush3.bf16.msra.mxu1 %v2439_v35 }
 0x244   : > { %2299 = vmatprep.subr.bf16.mxu1 %v2549_v0 }
 0x245   : > { %2276 = vmatpush3.bf16.msra.mxu0 %v2440_v36 }
 0x246   : > { %2277 = vmatprep.subr.bf16.mxu0 %v2549_v0 }
 0x247   : > { %2300 = vmatpush3.bf16.msra.mxu1 %v2441_v37 }
 0x248   : > { %2301 = vmatprep.subr.bf16.mxu1 %v2549_v0 }
 0x249   : > { %2278 = vmatpush3.bf16.msra.mxu0 %v2442_v38 }
 0x24a   : > { %2279 = vmatprep.subr.bf16.mxu0 %v2549_v0 }
 0x24b   : > { %2302 = vmatpush3.bf16.msra.mxu1 %v2443_v39 }
 0x24c   : > { %2303 = vmatprep.subr.bf16.mxu1 %v2549_v0 }
 0x24d   : > { %2280 = vmatpush3.bf16.msra.mxu0 %v2444_v40 }
 0x24e   : > { %2281 = vmatprep.subr.bf16.mxu0 %v2549_v0 }
 0x24f   : > { %2304 = vmatpush3.bf16.msra.mxu1 %v2445_v41 }
 0x250   : > { %2305 = vmatprep.subr.bf16.mxu1 %v2549_v0 }
 0x251   : > { %2282 = vmatpush3.bf16.msra.mxu0 %v2446_v42 }
 0x252   : > { %2283 = vmatprep.subr.bf16.mxu0 %v2549_v0 }
 0x253   : > { %2306 = vmatpush3.bf16.msra.mxu1 %v2447_v43 }
 0x255   : > { %2284 = vmatpush3.bf16.msra.mxu0 %v2448_v46 }
 0x256   : > { %2308 = vmatmul.mubr.bf16.vlgmr.msra.gmra.mxu1 %v1612_v47  ;;  %2285 = vmatprep.subr.bf16.mxu0 %v2549_v0 }
 0x259   : > { %2286 = vmatpush3.bf16.msra.mxu0 %v2449_v48 }
 0x25c   : > { %2288 = vmatmul.mubr.bf16.vlgmr.msra.gmra.mxu0 %v1502_v49 }
 0x2f6   : > { %v1478_v50 = vpop.f32.mrf.mxu1 }
 0x2f8   : > { %v2269_v51 = vpop.f32.mrf.mxu1 }
 0x2fa   : > { %v1481_v52 = vpop.f32.mrf.mxu1 }
 0x2fc   : > { %v1390_v53 = vpop.f32.mrf.mxu0  ;;  %v2270_v54 = vpop.f32.mrf.mxu1 }
 0x2fd   : > { %v1479_v61 = vadd.f32 %v1478_v50, %v1390_v53 }
 0x2fe   : > { %v2249_v55 = vpop.f32.mrf.mxu0 }
 0x300   : > { %v1393_v56 = vpop.f32.mrf.mxu0 }
 0x302   : > { %v2250_v57 = vpop.f32.mrf.mxu0 }
 0x316   : > { %v1696_v58 = vpop.f32.mrf.mxu1 }
 0x318   : > { %v2309_v59 = vpop.f32.mrf.mxu1 }
 0x31a   : > { %v1699_v60 = vpop.f32.mrf.mxu1 }
 0x31c   : > { %v1586_v62 = vpop.f32.mrf.mxu0  ;;  %v2310_v63 = vpop.f32.mrf.mxu1 }
 0x31d   : > { %v1592_v0 = vadd.f32 %v1586_v62, %v1479_v61 }
 0x31e   : > { %v2289_v2 = vpop.f32.mrf.mxu0 }
 0x31f   : > { %v1702_v3 = vadd.f32 %v1696_v58, %v1592_v0 }
 0x320   : > { %v1589_v4 = vpop.f32.mrf.mxu0 }
 0x321   : > { %v1710_v5 = vadd.f32 %v1959_v1, %v1702_v3 }
 0x322   : > { %v2290_v6 = vpop.f32.mrf.mxu0 }
 0x323   : > { %1711 = vst [vmem:[%s354_s19] sm:$0x7f] %v1710_v5  ;;  %v1713_v7 = vsel %vm1712_vm1, %v1710_v5, 0.0  ;;  %v1720_v8 = vmul.f32 %v1710_v5, %v1710_v5 }
 0x324   : > { %v1714_v9 = vrot.slane %v1713_v7, 4 }
 0x325   : > { %v1721_v10 = vsel %vm1712_vm1, %v1720_v8, 0.0 }
 0x326   : > { %v1715_v11 = vadd.f32 %v1714_v9, %v1713_v7  ;;  %v1722_v12 = vrot.slane %v1721_v10, 4 }
 0x328   : > { %v1716_v13 = vrot.slane %v1715_v11, 2  ;;  %v1723_v14 = vadd.f32 %v1722_v12, %v1721_v10 }
 0x32a   : > { %v1717_v15 = vadd.f32 %v1716_v13, %v1715_v11  ;;  %v1724_v16 = vrot.slane %v1723_v14, 2 }
 0x32c   : > { %v1718_v17 = vrot.slane %v1717_v15, 1  ;;  %v1725_v18 = vadd.f32 %v1724_v16, %v1723_v14 }
 0x32e   : > { %v1726_v19 = vrot.slane %v1725_v18, 1  ;;  %v1719_v20 = vadd.f32 %v1718_v17, %v1717_v15 }
 0x330   : > { %v1727_v21 = vadd.f32 %v1726_v19, %v1725_v18 }
 0x332   : > { %v1729_v22 = vsel %vm1728_vm2, %v1719_v20, %v1727_v21 }
 0x333   : > { %1730 = vst [vmem:[%s358_s23] sm:$0x3] %v1729_v22 }
 0x334 PF: > { %s21_s27 = sadd.s32 1, %s2542_s27  }
 0x335   : > { %p18_p2 = scmp.ge.s32.totalorder %s21_s27, 4  }
 0x337   :  { %20 = sbr.rel (!%p18_p2) target bundleno = 2 (0x2), region = 112 }
 0x33c   :  { %1764 = vsyncpa [#allocation3], 1 }
 0x33d   :  { %1766 = vsyncpa [#allocation3 + $0x1], 1 }
 0x33e   :  { %1767 = vsyncpa [#allocation5], 1 }

// kernel: audio_encoder_forward.3
= control target key start
LH: loop header
LB: loop body
LE: loop exit
PB: predicated region body
PF: predicated region fallthrough
CT: control target
= control target key end

     0   :  { %s2676_s30 = smov 0   ;;  %s3168_s0 = inlined_call_operand.vmem [shape: f32[2,7,128], index: 0, kind: input, shape index: {}]   ;;  %s3169_s1 = inlined_call_operand.vmem [shape: f32[1,128], index: 1, kind: input, shape index: {}]   ;;  %s3170_s2 = inlined_call_operand.vmem [shape: f32[1,128], index: 2, kind: input, shape index: {}]   ;;  %s3171_s3 = inlined_call_operand.vmem [shape: bf16[4,128,128], index: 3, kind: input, shape index: {}]   ;;  %s3172_s4 = inlined_call_operand.vmem [shape: f32[1,128], index: 4, kind: input, shape index: {}]   ;;  %s3173_s5 = inlined_call_operand.vmem [shape: bf16[4,128,128], index: 5, kind: input, shape index: {}]   ;;  %s3174_s6 = inlined_call_operand.vmem [shape: f32[1,128], index: 6, kind: input, shape index: {}]   ;;  %s3175_s7 = inlined_call_operand.vmem [shape: bf16[4,128,128], index: 7, kind: input, shape index: {}]   ;;  %s3176_s8 = inlined_call_operand.vmem [shape: f32[1,128], index: 8, kind: input, shape index: {}]   ;;  %s3177_s9 = inlined_call_operand.vmem [shape: f32[2,16,128], index: 9, kind: output, shape index: {}]  }
   0x1 LB: > { %s1888_s10 = sadd.s32 4294967295, %s2619_s30   ;;  %p1892_p0 = scmp.ge.s32.totalorder %s2619_s30, 1  ;;  %s2619_s30 = sphi %s2676_s30, %s19_s30  }
   0x2   : > { %p286_p1 = scmp.lt.s32.totalorder %s2619_s30, 3 }
   0x4   : > { %p287_p2 = pnand %p1892_p0, %p286_p1 }
   0x5   : > { %p321_p3 = scmp.lt.s32.totalorder (!%p287_p2), %s1888_s10, 1 }
   0x6   : > { %290 = sbr.rel (%p287_p2) target bundleno = 785 (0x311), region = 56 }
   0xb   : > { %v2517_v0 = vld [vmem:[%s3171_s3 + $0x38] sm:$0xff]   ;;  %v2621_v1 = vmov 0.0   ;;  %v2519_v3 = vld [vmem:[%s3171_s3 + $0x30] sm:$0xff]   ;;  %vm2622_vm0 = vmmov 0   ;;  %v2521_v5 = vld [vmem:[%s3171_s3 + $0x28] sm:$0xff]   ;;  %s3181_s10 = smov (!%p321_p3, %s1888_s10), 1  ;;  %v348_v7 = vlaneseq }
   0xc   : > { %2284 = vmatprep.subr.bf16.mxu1 %v2621_v1  ;;  %2264 = vmatprep.subr.bf16.mxu0 %v2621_v1  ;;  %v2518_v2 = vld [vmem:[%s3171_s3 + $0x78] sm:$0xff]   ;;  %v2520_v4 = vld [vmem:[%s3171_s3 + $0x70] sm:$0xff]   ;;  %v2522_v6 = vld [vmem:[%s3171_s3 + $0x68] sm:$0xff]   ;;  %s1893_s25 = sshll.u32 %s3181_s10, 3  ;;  %vm387_vm4 = vcmask 1043456   ;;  %vm400_vm5 = vcmask 1040384  }
   0xd   : > { %2285 = vmatpush3.bf16.msra.mxu1 %v2517_v0  ;;  %2300 = vmatprep.mubr.msk.bf16.mxu1 %vm2622_vm0, %v2621_v1  ;;  %v2523_v8 = vld [vmem:[%s3171_s3 + $0x20] sm:$0xff]   ;;  %v2722_v10 = vshrl.u32 %v348_v7, 7  ;;  %s324_s11 = scalar_lea.vmem %s3168_s0, %s1893_s25  ;;  %v2525_v11 = vld [vmem:[%s3171_s3 + $0x18] sm:$0xff]   ;;  %v2527_v18 = vld [vmem:[%s3171_s3 + $0x10] sm:$0xff]   ;;  %vm402_vm6 = vcmask 1044480   ;;  %vm415_vm7 = vcmask 1041408  }
   0xe   : > { %2286 = vmatprep.subr.bf16.mxu1 %v2621_v1  ;;  %2265 = vmatpush3.bf16.msra.mxu0 %v2518_v2  ;;  %v2524_v9 = vld [vmem:[%s3171_s3 + $0x60] sm:$0xff]   ;;  %v2526_v12 = vld [vmem:[%s3171_s3 + $0x58] sm:$0xff]   ;;  %v2528_v19 = vld [vmem:[%s3171_s3 + $0x50] sm:$0xff]   ;;  %vm417_vm8 = vcmask 1045504   ;;  %vm430_vm9 = vcmask 1042432   ;;  %s2155_s25 = sshll.u32 %s3181_s10, 4 }
   0xf   : > { %2266 = vmatprep.subr.bf16.mxu0 %v2621_v1  ;;  %2280 = vmatprep.mubr.msk.bf16.mxu0 %vm2622_vm0, %v2621_v1  ;;  %v354_v13 = vadd.s32 1, %v2722_v10  ;;  %v331_v14 = vld [vmem:[%s324_s11] sm:$0x7f]  ;;  %v356_v22 = vrot.slane %v2722_v10, 7  ;;  %v365_v23 = vadd.s32 2, %v2722_v10  ;;  %v376_v27 = vadd.s32 3, %v2722_v10  ;;  %s329_s11 = scalar_lea.vmem %s3177_s9, %s2155_s25 }
  0x10   : > { %v1896_v15 = vld [vmem:[%s3169_s1] ss:$0 sm:$0xff]  ;;  %v2529_v28 = vld [vmem:[%s3171_s3 + $0x8] sm:$0xff]   ;;  %v383_v43 = vrot.slane %v2722_v10, 5 }
  0x11   : > { %2287 = vmatpush3.bf16.msra.mxu1 %v2519_v3  ;;  %v1897_v16 = vld [vmem:[%s3170_s2] ss:$0 sm:$0xff]  ;;  %v339_v17 = vmul.f32 %v1896_v15, %v331_v14  ;;  %v355_v21 = vrot.slane %v354_v13, 7  ;;  %v2530_v29 = vld [vmem:[%s3171_s3 + $0x48] sm:$0xff]   ;;  %v366_v33 = vrot.slane %v365_v23, 6  ;;  %v377_v38 = vrot.slane %v376_v27, 5 }
  0x12   : > { %2288 = vmatprep.subr.bf16.mxu1 %v2621_v1  ;;  %2267 = vmatpush3.bf16.msra.mxu0 %v2520_v4  ;;  %v2531_v34 = vld [vmem:[%s3171_s3] sm:$0xff]   ;;  %v2537_v23 = vld [vmem:[%s3171_s3 + $0xe8] sm:$0xff]   ;;  %v2536_v27 = vld [vmem:[%s3171_s3 + $0xb0] sm:$0xff]  }
  0x13   : > { %2268 = vmatprep.subr.bf16.mxu0 %v2621_v1  ;;  %v347_v20 = vadd.f32 %v1897_v16, %v339_v17  ;;  %v2532_v39 = vld [vmem:[%s3171_s3 + $0x40] sm:$0xff]  }
  0x15   : > { %2289 = vmatpush3.bf16.msra.mxu1 %v2521_v5  ;;  %v351_v24 = vrot.slane %v347_v20, 7  ;;  %v358_v25 = vrot.slane %v347_v20, 1  ;;  %v369_v26 = vrot.slane %v347_v20, 2  ;;  %v380_v31 = vrot.slane %v347_v20, 3 }
  0x16   : > { %2290 = vmatprep.subr.bf16.mxu1 %v2621_v1  ;;  %2269 = vmatpush3.bf16.msra.mxu0 %v2522_v6 }
  0x17   : > { %2270 = vmatprep.subr.bf16.mxu0 %v2621_v1  ;;  %vm353_vm1 = vcmp.gt.f32.partialorder %v347_v20, %v351_v24  ;;  %v360_v30 = vmax.f32 %v347_v20, %v358_v25 }
  0x18   : > { %v357_v32 = vsel %vm353_vm1, %v355_v21, %v356_v22 }
  0x19   : > { %2291 = vmatpush3.bf16.msra.mxu1 %v2523_v8  ;;  %v362_v35 = vrot.slane %v360_v30, 6  ;;  %v367_v36 = vrot.slane %v357_v32, 7  ;;  %v371_v37 = vmax.f32 %v360_v30, %v369_v26  ;;  %v2541_v30 = vld [vmem:[%s3171_s3 + $0xd8] sm:$0xff]   ;;  %v2543_v32 = vld [vmem:[%s3171_s3 + $0xd0] sm:$0xff]  }
  0x1a   : > { %2292 = vmatprep.subr.bf16.mxu1 %v2621_v1  ;;  %2271 = vmatpush3.bf16.msra.mxu0 %v2524_v9 }
  0x1b   : > { %2272 = vmatprep.subr.bf16.mxu0 %v2621_v1  ;;  %vm364_vm2 = vcmp.gt.f32.partialorder %v347_v20, %v362_v35  ;;  %v373_v40 = vrot.slane %v371_v37, 5  ;;  %v382_v41 = vmax.f32 %v371_v37, %v380_v31  ;;  %v2540_v31 = vld [vmem:[%s3171_s3 + $0xa0] sm:$0xff]   ;;  %v2544_v35 = vld [vmem:[%s3171_s3 + $0x90] sm:$0xff]   ;;  %v2546_v37 = vld [vmem:[%s3171_s3 + $0x88] sm:$0xff]  }
  0x1c   : > { %v368_v42 = vsel %vm364_vm2, %v366_v33, %v367_v36  ;;  %v2542_v33 = vld [vmem:[%s3171_s3 + $0x98] sm:$0xff]   ;;  %v2547_v36 = vld [vmem:[%s3171_s3 + $0xc0] sm:$0xff]  }
  0x1d   : > { %2293 = vmatpush3.bf16.msra.mxu1 %v2525_v11  ;;  %vm375_vm3 = vcmp.gt.f32.partialorder %v347_v20, %v373_v40  ;;  %v378_v44 = vrot.slane %v368_v42, 7  ;;  %v398_v45 = vrot.slane %v382_v41, 7  ;;  %v388_v48 = vsel %vm387_vm4, %v382_v41, 0.0  ;;  %v2533_v11 = vld [vmem:[%s3171_s3 + $0xf8] sm:$0xff]   ;;  %v2550_v42 = vld [vmem:[%s3173_s5 + $0x30] sm:$0xff]  }
  0x1e   : > { %2294 = vmatprep.subr.bf16.mxu1 %v2621_v1  ;;  %2273 = vmatpush3.bf16.msra.mxu0 %v2526_v12  ;;  %v413_v49 = vrot.slane %v382_v41, 6  ;;  %v428_v51 = vrot.slane %v382_v41, 5  ;;  %v2534_v20 = vld [vmem:[%s3171_s3 + $0xb8] sm:$0xff]  }
  0x1f   : > { %2274 = vmatprep.subr.bf16.mxu0 %v2621_v1  ;;  %v379_v46 = vsel %vm375_vm3, %v377_v38, %v378_v44  ;;  %v401_v50 = vsel %vm400_vm5, 0.0, %v398_v45  ;;  %vm2790_vm3 = vmneg %vm430_vm9  ;;  %v2549_v40 = vld [vmem:[%s3173_s5 + $0x38] sm:$0xff]   ;;  %v2552_v44 = vld [vmem:[%s3173_s5 + $0x28] sm:$0xff]  }
  0x20   : > { %v384_v47 = vsub.s32 %v379_v46, %v383_v43  ;;  %v416_v58 = vsel %vm415_vm7, 0.0, %v413_v49  ;;  %v403_v60 = vsel %vm402_vm6, %v401_v50, 0.0  ;;  %v431_v2 = vsel %vm430_vm9, 0.0, %v428_v51  ;;  %v2551_v41 = vld [vmem:[%s3173_s5 + $0x78] sm:$0xff]   ;;  %v2553_v43 = vld [vmem:[%s3173_s5 + $0x70] sm:$0xff]   ;;  %v2554_v45 = vld [vmem:[%s3173_s5 + $0x20] sm:$0xff]  }
  0x21   : > { %2295 = vmatpush3.bf16.msra.mxu1 %v2527_v18  ;;  %v418_v4 = vsel %vm417_vm8, %v416_v58, 0.0  ;;  %v2555_v46 = vld [vmem:[%s3173_s5 + $0x68] sm:$0xff]   ;;  %v2558_v49 = vld [vmem:[%s3173_s5 + $0x10] sm:$0xff]   ;;  %v2559_v50 = vld [vmem:[%s3173_s5 + $0x58] sm:$0xff]  }
  0x22   : > { %2296 = vmatprep.subr.bf16.mxu1 %v2621_v1  ;;  %2275 = vmatpush3.bf16.msra.mxu0 %v2528_v19  ;;  %vm385_vm10 = vcmp.eq.s32.totalorder %v384_v47, 0  ;;  %vm395_vm11 = vcmp.eq.s32.totalorder %v384_v47, 1  ;;  %vm411_vm12 = vcmp.eq.s32.totalorder %v384_v47, 2  ;;  %vm426_vm13 = vcmp.eq.s32.totalorder %v384_v47, 3  ;;  %v2535_v19 = vld [vmem:[%s3171_s3 + $0xf0] sm:$0xff]   ;;  %v2556_v47 = vld [vmem:[%s3173_s5 + $0x18] sm:$0xff]  }
  0x23   : > { %2276 = vmatprep.subr.bf16.mxu0 %v2621_v1  ;;  %v386_v52 = vsel %vm385_vm10, 1.0, %v2621_v1  ;;  %v396_v53 = vsel %vm395_vm11, 1.0, %v2621_v1  ;;  %v412_v54 = vsel %vm411_vm12, 1.0, %v2621_v1  ;;  %v427_v55 = vsel %vm426_vm13, 1.0, %v2621_v1  ;;  %v2560_v51 = vld [vmem:[%s3173_s5 + $0x8] sm:$0xff]  }
  0x24   : > { %v390_v56 = vrot.slane %v386_v52, 3  ;;  %v405_v57 = vrot.slane %v396_v53, 2  ;;  %v420_v59 = vrot.slane %v412_v54, 1  ;;  %v432_v61 = vsel %vm430_vm9, 0.0, %v427_v55  ;;  %v2561_v52 = vld [vmem:[%s3173_s5 + $0x50] sm:$0xff]   ;;  %v2562_v53 = vld [vmem:[%s3173_s5] sm:$0xff]  }
  0x25   : > { %2297 = vmatpush3.bf16.msra.mxu1 %v2529_v28  ;;  %vm433_vm2 = vcmp.gt.f32.partialorder %v432_v61, 0.5  ;;  %v2539_v28 = vld [vmem:[%s3171_s3 + $0xe0] sm:$0xff]   ;;  %v2563_v54 = vld [vmem:[%s3173_s5 + $0x48] sm:$0xff]  }
  0x26   : > { %2298 = vmatprep.subr.bf16.mxu1 %v2621_v1  ;;  %2277 = vmatpush3.bf16.msra.mxu0 %v2530_v29  ;;  %v392_v62 = vsel %vm387_vm4, %v390_v56, 0.0  ;;  %v407_v63 = vsel %vm400_vm5, 0.0, %v405_v57  ;;  %v422_v0 = vsel %vm415_vm7, 0.0, %v420_v59  ;;  %vm1931_vm4 = vmpackc.low %vm415_vm7, %vm2790_vm3  ;;  %v2538_v29 = vld [vmem:[%s3171_s3 + $0xa8] sm:$0xff]   ;;  %v2565_v55 = vld [vmem:[%s3173_s5 + $0x40] sm:$0xff]  }
  0x27   : > { %2278 = vmatprep.subr.bf16.mxu0 %v2621_v1  ;;  %vm393_vm14 = vcmp.gt.f32.partialorder %v392_v62, 0.5  ;;  %v408_v3 = vsel %vm402_vm6, %v407_v63, 0.0  ;;  %v423_v5 = vsel %vm417_vm8, %v422_v0, 0.0  ;;  %vm2016_vm5 = vmpackc.low %vm402_vm6, %vm2790_vm3  ;;  %vm1396_vm8 = vsmask.f32 7424 }
  0x28   : > { %v394_v6 = vsel %vm393_vm14, %v388_v48, 0.0  ;;  %vm409_vm15 = vcmp.gt.f32.partialorder %v408_v3, 0.5  ;;  %vm424_vm1 = vcmp.gt.f32.partialorder %v423_v5, 0.5  ;;  %v2557_v48 = vld [vmem:[%s3173_s5 + $0x60] sm:$0xff]  }
  0x29   : > { %2299 = vmatpush3.bf16.msra.mxu1 %v2531_v34  ;;  %v410_v8 = vsel %vm409_vm15, %v403_v60, %v394_v6  ;;  %v2545_v34 = vld [vmem:[%s3171_s3 + $0xc8] sm:$0xff]  }
  0x2a   : > { %2324 = vmatprep.subr.bf16.mxu1 %v2621_v1  ;;  %2279 = vmatpush3.bf16.msra.mxu0 %v2532_v39  ;;  %v425_v9 = vsel %vm424_vm1, %v418_v4, %v410_v8  ;;  %v2548_v39 = vld [vmem:[%s3171_s3 + $0x80] sm:$0xff]  }
  0x2b   : > { %2304 = vmatprep.subr.bf16.mxu0 %v2621_v1  ;;  %v434_v10 = vsel %vm433_vm2, %v431_v2, %v425_v9 }
  0x2c   : > { %v436_v12 = vrot.slane %v434_v10, 5 }
  0x2e   : > { %v1932_v13 = vpack.c.bf16 %v436_v12, %v436_v12  ;;  %v438_v14 = vsel %vm430_vm9, 0.0, %v436_v12  ;;  %v439_v15 = vsel %vm415_vm7, %v436_v12, 0.0  ;;  %v1982_v12 = vld [vmem:[%s3172_s4] ss:$0 sm:$0xff] }
  0x2f   : > { %v440_v16 = vpack.c.bf16 %v439_v15, %v438_v14 }
  0x30   : > { %2301 = vmatmul.mubr.msk.bf16.vlgmr.msra.gmra.mxu1 %vm1931_vm4, %v1932_v13 }
  0x31   : > { %2325 = vmatpush3.bf16.msra.mxu1 %v2533_v11  ;;  %v475_v17 = vshrl.u32 %v440_v16, 16  ;;  %v477_v18 = vshll.u32 %v440_v16, 16  ;;  %2340 = vmatprep.mubr.msk.bf16.mxu1 %vm2622_vm0, %v2621_v1  ;;  %v678_v25 = vrot.slane %v440_v16, 1 }
  0x32   : > { %2326 = vmatprep.subr.bf16.mxu1 %v2621_v1 }
  0x33   : > { %v479_v21 = vrot.slane %v477_v18, 1  ;;  %v788_v22 = vrot.slane %v475_v17, 1  ;;  %v789_v24 = vrot.slane %v477_v18, 2 }
  0x35   : > { %v480_v26 = vor.u32 %v479_v21, %v475_v17  ;;  %2327 = vmatpush3.bf16.msra.mxu1 %v2535_v19  ;;  %v790_v38 = vor.u32 %v789_v24, %v788_v22  ;;  %v2564_v22 = vld [vmem:[%s3173_s5 + $0xf8] sm:$0xff]  }
  0x36   : > { %2328 = vmatprep.subr.bf16.mxu1 %v2621_v1 }
  0x37   : > { %2281 = vmatmul.mubr.bf16.vlgmr.msra.gmra.mxu0 %v480_v26 }
  0x38   : > { %2305 = vmatpush3.bf16.msra.mxu0 %v2534_v20  ;;  %2320 = vmatprep.mubr.msk.bf16.mxu0 %vm2622_vm0, %v2621_v1 }
  0x39   : > { %2306 = vmatprep.subr.bf16.mxu0 %v2621_v1  ;;  %2329 = vmatpush3.bf16.msra.mxu1 %v2537_v23 }
  0x3a   : > { %2330 = vmatprep.subr.bf16.mxu1 %v2621_v1 }
  0x3c   : > { %2307 = vmatpush3.bf16.msra.mxu0 %v2536_v27  ;;  %v2566_v27 = vld [vmem:[%s3173_s5 + $0xf0] sm:$0xff]  }
  0x3d   : > { %2308 = vmatprep.subr.bf16.mxu0 %v2621_v1  ;;  %2331 = vmatpush3.bf16.msra.mxu1 %v2539_v28 }
  0x3e   : > { %2332 = vmatprep.subr.bf16.mxu1 %v2621_v1 }
  0x40   : > { %2309 = vmatpush3.bf16.msra.mxu0 %v2538_v29 }
  0x41   : > { %2310 = vmatprep.subr.bf16.mxu0 %v2621_v1  ;;  %2333 = vmatpush3.bf16.msra.mxu1 %v2541_v30 }
  0x42   : > { %2334 = vmatprep.subr.bf16.mxu1 %v2621_v1 }
  0x44   : > { %2311 = vmatpush3.bf16.msra.mxu0 %v2540_v31  ;;  %v2567_v31 = vld [vmem:[%s3173_s5 + $0xb8] sm:$0xff]  }
  0x45   : > { %2312 = vmatprep.subr.bf16.mxu0 %v2621_v1  ;;  %2335 = vmatpush3.bf16.msra.mxu1 %v2543_v32 }
  0x46   : > { %2336 = vmatprep.subr.bf16.mxu1 %v2621_v1 }
  0x48   : > { %2313 = vmatpush3.bf16.msra.mxu0 %v2542_v33  ;;  %v2568_v33 = vld [vmem:[%s3173_s5 + $0xe8] sm:$0xff]  }
  0x49   : > { %2314 = vmatprep.subr.bf16.mxu0 %v2621_v1  ;;  %2337 = vmatpush3.bf16.msra.mxu1 %v2545_v34  ;;  %v2569_v34 = vld [vmem:[%s3173_s5 + $0xb0] sm:$0xff]  }
  0x4a   : > { %2338 = vmatprep.subr.bf16.mxu1 %v2621_v1 }
  0x4c   : > { %2315 = vmatpush3.bf16.msra.mxu0 %v2544_v35  ;;  %v2570_v35 = vld [vmem:[%s3173_s5 + $0xe0] sm:$0xff]  }
  0x4d   : > { %2316 = vmatprep.subr.bf16.mxu0 %v2621_v1  ;;  %2339 = vmatpush3.bf16.msra.mxu1 %v2547_v36  ;;  %v2571_v36 = vld [vmem:[%s3173_s5 + $0xa8] sm:$0xff]  }
  0x4e   : > { %2364 = vmatprep.subr.bf16.mxu1 %v2621_v1 }
  0x50   : > { %2317 = vmatpush3.bf16.msra.mxu0 %v2546_v37  ;;  %2341 = vmatmul.mubr.bf16.vlgmr.msra.gmra.mxu1 %v790_v38  ;;  %v2572_v37 = vld [vmem:[%s3173_s5 + $0xd8] sm:$0xff]   ;;  %v2573_v38 = vld [vmem:[%s3173_s5 + $0xa0] sm:$0xff]  }
  0x51   : > { %2318 = vmatprep.subr.bf16.mxu0 %v2621_v1  ;;  %2380 = vmatprep.mubr.msk.bf16.mxu1 %vm2622_vm0, %v2621_v1 }
  0x52   : > { %2365 = vmatpush3.bf16.msra.mxu1 %v2549_v40  ;;  %v2575_v40 = vld [vmem:[%s3173_s5 + $0x98] sm:$0xff]  }
  0x53   : > { %2366 = vmatprep.subr.bf16.mxu1 %v2621_v1 }
  0x54   : > { %2319 = vmatpush3.bf16.msra.mxu0 %v2548_v39  ;;  %v2574_v39 = vld [vmem:[%s3173_s5 + $0xd0] sm:$0xff]  }
  0x55   : > { %2344 = vmatprep.subr.bf16.mxu0 %v2621_v1 }
  0x56   : > { %2367 = vmatpush3.bf16.msra.mxu1 %v2550_v42  ;;  %v2577_v42 = vld [vmem:[%s3173_s5 + $0x90] sm:$0xff]  }
  0x57   : > { %2321 = vmatmul.mubr.bf16.vlgmr.msra.gmra.mxu0 %v678_v25  ;;  %2368 = vmatprep.subr.bf16.mxu1 %v2621_v1 }
  0x58   : > { %2360 = vmatprep.mubr.msk.bf16.mxu0 %vm2622_vm0, %v2621_v1  ;;  %2345 = vmatpush3.bf16.msra.mxu0 %v2551_v41  ;;  %v2576_v41 = vld [vmem:[%s3173_s5 + $0xc8] sm:$0xff]  }
  0x59   : > { %2346 = vmatprep.subr.bf16.mxu0 %v2621_v1 }
  0x5a   : > { %2369 = vmatpush3.bf16.msra.mxu1 %v2552_v44 }
  0x5b   : > { %2370 = vmatprep.subr.bf16.mxu1 %v2621_v1 }
  0x5c   : > { %2347 = vmatpush3.bf16.msra.mxu0 %v2553_v43  ;;  %v2578_v43 = vld [vmem:[%s3173_s5 + $0xc0] sm:$0xff]  }
  0x5d   : > { %2348 = vmatprep.subr.bf16.mxu0 %v2621_v1 }
  0x5e   : > { %2371 = vmatpush3.bf16.msra.mxu1 %v2554_v45 }
  0x5f   : > { %2372 = vmatprep.subr.bf16.mxu1 %v2621_v1 }
  0x60   : > { %2349 = vmatpush3.bf16.msra.mxu0 %v2555_v46  ;;  %v2579_v46 = vld [vmem:[%s3173_s5 + $0x88] sm:$0xff]  }
  0x61   : > { %2350 = vmatprep.subr.bf16.mxu0 %v2621_v1 }
  0x62   : > { %2373 = vmatpush3.bf16.msra.mxu1 %v2556_v47 }
  0x63   : > { %2374 = vmatprep.subr.bf16.mxu1 %v2621_v1 }
  0x64   : > { %2351 = vmatpush3.bf16.msra.mxu0 %v2557_v48  ;;  %v2580_v48 = vld [vmem:[%s3173_s5 + $0x80] sm:$0xff]  }
  0x65   : > { %2352 = vmatprep.subr.bf16.mxu0 %v2621_v1 }
  0x66   : > { %2375 = vmatpush3.bf16.msra.mxu1 %v2558_v49 }
  0x67   : > { %2376 = vmatprep.subr.bf16.mxu1 %v2621_v1 }
  0x68   : > { %2353 = vmatpush3.bf16.msra.mxu0 %v2559_v50  ;;  %v2581_v50 = vld [vmem:[%s3175_s7 + $0x38] sm:$0xff]  }
  0x69   : > { %2354 = vmatprep.subr.bf16.mxu0 %v2621_v1 }
  0x6a   : > { %2377 = vmatpush3.bf16.msra.mxu1 %v2560_v51  ;;  %v2583_v51 = vld [vmem:[%s3175_s7 + $0x78] sm:$0xff]  }
  0x6b   : > { %2378 = vmatprep.subr.bf16.mxu1 %v2621_v1 }
  0x6c   : > { %2355 = vmatpush3.bf16.msra.mxu0 %v2561_v52  ;;  %v2582_v52 = vld [vmem:[%s3175_s7 + $0x30] sm:$0xff]  }
  0x6d   : > { %2356 = vmatprep.subr.bf16.mxu0 %v2621_v1 }
  0x6e   : > { %2379 = vmatpush3.bf16.msra.mxu1 %v2562_v53  ;;  %v2584_v53 = vld [vmem:[%s3175_s7 + $0x28] sm:$0xff]  }
  0x6f   : > { %2404 = vmatprep.subr.bf16.mxu1 %v2621_v1 }
  0x70   : > { %2357 = vmatpush3.bf16.msra.mxu0 %v2563_v54  ;;  %v2585_v54 = vld [vmem:[%s3175_s7 + $0x70] sm:$0xff]  }
  0x71   : > { %2358 = vmatprep.subr.bf16.mxu0 %v2621_v1 }
  0x74   : > { %2359 = vmatpush3.bf16.msra.mxu0 %v2565_v55  ;;  %v2586_v55 = vld [vmem:[%s3175_s7 + $0x20] sm:$0xff]  }
  0x75   : > { %2384 = vmatprep.subr.bf16.mxu0 %v2621_v1 }
  0xf0   : > { %v653_v56 = vpop.f32.mrf.mxu1 }
  0xf2   : > { %v2302_v57 = vpop.f32.mrf.mxu1 }
  0xf3   : > { %v2588_v57 = vld [vmem:[%s3175_s7 + $0x18] sm:$0xff]  }
  0xf4   : > { %v656_v58 = vpop.f32.mrf.mxu1 }
  0xf6   : > { %v2303_v59 = vpop.f32.mrf.mxu1 }
  0xf7   : > { %v564_v60 = vpop.f32.mrf.mxu0  ;;  %v2590_v59 = vld [vmem:[%s3175_s7 + $0x10] sm:$0xff]  }
  0xf8   : > { %v654_v4 = vadd.f32 %v653_v56, %v564_v60  ;;  %v2587_v56 = vld [vmem:[%s3175_s7 + $0x68] sm:$0xff]   ;;  %v2591_v60 = vld [vmem:[%s3175_s7 + $0x58] sm:$0xff]  }
  0xf9   : > { %v2282_v61 = vpop.f32.mrf.mxu0 }
  0xfa   : > { %v2592_v61 = vld [vmem:[%s3175_s7 + $0x8] sm:$0xff]  }
  0xfb   : > { %v567_v62 = vpop.f32.mrf.mxu0 }
  0xfc   : > { %v657_v10 = vadd.f32 %v656_v58, %v567_v62  ;;  %v2589_v58 = vld [vmem:[%s3175_s7 + $0x60] sm:$0xff]   ;;  %v2593_v62 = vld [vmem:[%s3175_s7 + $0x50] sm:$0xff]  }
  0xfd   : > { %v2283_v63 = vpop.f32.mrf.mxu0 }
  0xfe   : > { %v2594_v63 = vld [vmem:[%s3175_s7] sm:$0xff]  }
 0x110   : > { %v874_v0 = vpop.f32.mrf.mxu1 }
 0x112   : > { %v2342_v2 = vpop.f32.mrf.mxu1 }
 0x113   : > { %v2597_v2 = vld [vmem:[%s3175_s7 + $0x40] sm:$0xff]  }
 0x114   : > { %v877_v3 = vpop.f32.mrf.mxu1 }
 0x116   : > { %v2343_v5 = vpop.f32.mrf.mxu1 }
 0x117   : > { %v762_v6 = vpop.f32.mrf.mxu0 }
 0x118   : > { %v769_v8 = vadd.f32 %v762_v6, %v654_v4 }
 0x119   : > { %v2322_v9 = vpop.f32.mrf.mxu0 }
 0x11a   : > { %v881_v11 = vadd.f32 %v874_v0, %v769_v8  ;;  %v2595_v0 = vld [vmem:[%s3175_s7 + $0x48] sm:$0xff]  }
 0x11b   : > { %v765_v13 = vpop.f32.mrf.mxu0 }
 0x11c   : > { %v770_v14 = vadd.f32 %v765_v13, %v657_v10  ;;  %v890_v15 = vadd.f32 %v1982_v12, %v881_v11 }
 0x11d   : > { %v2323_v16 = vpop.f32.mrf.mxu0 }
 0x11e   : > { %v882_v17 = vadd.f32 %v877_v3, %v770_v14  ;;  %v894_v19 = vrot.slane %v890_v15, 5 }
 0x120   : > { %v891_v18 = vadd.f32 %v1982_v12, %v882_v17  ;;  %v899_v23 = vsel %vm430_vm9, 0.0, %v894_v19 }
 0x122   : > { %v895_v20 = vrot.slane %v891_v18, 5 }
 0x124   : > { %v896_v21 = vsel %vm430_vm9, %v894_v19, %v895_v20 }
 0x125   : > { %v900_v24 = vsel %vm402_vm6, %v896_v21, 0.0  ;;  %v2017_v25 = vpack.c.bf16 %v896_v21, %v894_v19  ;;  %v2067_v19 = vld [vmem:[%s3174_s6] ss:$0 sm:$0xff]  ;;  %vm2623_vm6 = vmmov 1  }
 0x126   : > { %v901_v26 = vpack.c.bf16 %v900_v24, %v899_v23  ;;  %vm2101_vm7 = vmpackc.low %vm2623_vm6, %vm2790_vm3 }
 0x127   : > { %2381 = vmatmul.mubr.msk.bf16.vlgmr.msra.gmra.mxu1 %vm2016_vm5, %v2017_v25 }
 0x128   : > { %2405 = vmatpush3.bf16.msra.mxu1 %v2564_v22  ;;  %v938_v28 = vshll.u32 %v901_v26, 16  ;;  %2420 = vmatprep.mubr.msk.bf16.mxu1 %vm2622_vm0, %v2621_v1  ;;  %v936_v29 = vshrl.u32 %v901_v26, 16  ;;  %v1139_v49 = vrot.slane %v901_v26, 1 }
 0x129   : > { %2406 = vmatprep.subr.bf16.mxu1 %v2621_v1 }
 0x12a   : > { %v940_v30 = vrot.slane %v938_v28, 1  ;;  %v1249_v44 = vrot.slane %v936_v29, 1  ;;  %v1250_v45 = vrot.slane %v938_v28, 2 }
 0x12c   : > { %2407 = vmatpush3.bf16.msra.mxu1 %v2566_v27  ;;  %v941_v32 = vor.u32 %v940_v30, %v936_v29  ;;  %v1251_v47 = vor.u32 %v1250_v45, %v1249_v44  ;;  %v2601_v45 = vld [vmem:[%s3175_s7 + $0xb0] sm:$0xff]  }
 0x12d   : > { %2408 = vmatprep.subr.bf16.mxu1 %v2621_v1 }
 0x12e   : > { %2361 = vmatmul.mubr.bf16.vlgmr.msra.gmra.mxu0 %v941_v32 }
 0x12f   : > { %2385 = vmatpush3.bf16.msra.mxu0 %v2567_v31  ;;  %2400 = vmatprep.mubr.msk.bf16.mxu0 %vm2622_vm0, %v2621_v1 }
 0x130   : > { %2409 = vmatpush3.bf16.msra.mxu1 %v2568_v33  ;;  %2386 = vmatprep.subr.bf16.mxu0 %v2621_v1  ;;  %v2596_v33 = vld [vmem:[%s3175_s7 + $0xf8] sm:$0xff]  }
 0x131   : > { %2410 = vmatprep.subr.bf16.mxu1 %v2621_v1 }
 0x133   : > { %2387 = vmatpush3.bf16.msra.mxu0 %v2569_v34 }
 0x134   : > { %2411 = vmatpush3.bf16.msra.mxu1 %v2570_v35  ;;  %2388 = vmatprep.subr.bf16.mxu0 %v2621_v1 }
 0x135   : > { %2412 = vmatprep.subr.bf16.mxu1 %v2621_v1 }
 0x137   : > { %2389 = vmatpush3.bf16.msra.mxu0 %v2571_v36 }
 0x138   : > { %2413 = vmatpush3.bf16.msra.mxu1 %v2572_v37  ;;  %2390 = vmatprep.subr.bf16.mxu0 %v2621_v1  ;;  %v2598_v37 = vld [vmem:[%s3175_s7 + $0xf0] sm:$0xff]  }
 0x139   : > { %2414 = vmatprep.subr.bf16.mxu1 %v2621_v1 }
 0x13b   : > { %2391 = vmatpush3.bf16.msra.mxu0 %v2573_v38 }
 0x13c   : > { %2415 = vmatpush3.bf16.msra.mxu1 %v2574_v39  ;;  %2392 = vmatprep.subr.bf16.mxu0 %v2621_v1 }
 0x13d   : > { %2416 = vmatprep.subr.bf16.mxu1 %v2621_v1 }
 0x13f   : > { %2393 = vmatpush3.bf16.msra.mxu0 %v2575_v40  ;;  %v2624_v40 = vmov 0  }
 0x140   : > { %2417 = vmatpush3.bf16.msra.mxu1 %v2576_v41  ;;  %2394 = vmatprep.subr.bf16.mxu0 %v2621_v1  ;;  %v1407_v41 = vrot.slane %v2624_v40, 1 }
 0x141   : > { %2418 = vmatprep.subr.bf16.mxu1 %v2621_v1 }
 0x143   : > { %2395 = vmatpush3.bf16.msra.mxu0 %v2577_v42  ;;  %v2599_v42 = vld [vmem:[%s3175_s7 + $0xb8] sm:$0xff]  }
 0x144   : > { %2419 = vmatpush3.bf16.msra.mxu1 %v2578_v43  ;;  %2396 = vmatprep.subr.bf16.mxu0 %v2621_v1  ;;  %v2600_v43 = vld [vmem:[%s3175_s7 + $0xe8] sm:$0xff]  }
 0x145   : > { %2444 = vmatprep.subr.bf16.mxu1 %v2621_v1 }
 0x147   : > { %2397 = vmatpush3.bf16.msra.mxu0 %v2579_v46  ;;  %2421 = vmatmul.mubr.bf16.vlgmr.msra.gmra.mxu1 %v1251_v47  ;;  %v2602_v46 = vld [vmem:[%s3175_s7 + $0xe0] sm:$0xff]   ;;  %v2603_v47 = vld [vmem:[%s3175_s7 + $0xa8] sm:$0xff]  }
 0x148   : > { %2398 = vmatprep.subr.bf16.mxu0 %v2621_v1  ;;  %2460 = vmatprep.mubr.msk.bf16.mxu1 %vm2622_vm0, %v2621_v1 }
 0x149   : > { %2445 = vmatpush3.bf16.msra.mxu1 %v2581_v50  ;;  %v2606_v50 = vld [vmem:[%s3175_s7 + $0xd0] sm:$0xff]  }
 0x14a   : > { %2446 = vmatprep.subr.bf16.mxu1 %v2621_v1 }
 0x14b   : > { %2399 = vmatpush3.bf16.msra.mxu0 %v2580_v48  ;;  %v2604_v48 = vld [vmem:[%s3175_s7 + $0xd8] sm:$0xff]  }
 0x14c   : > { %2424 = vmatprep.subr.bf16.mxu0 %v2621_v1 }
 0x14d   : > { %2447 = vmatpush3.bf16.msra.mxu1 %v2582_v52  ;;  %v2608_v52 = vld [vmem:[%s3175_s7 + $0xc8] sm:$0xff]  }
 0x14e   : > { %2401 = vmatmul.mubr.bf16.vlgmr.msra.gmra.mxu0 %v1139_v49  ;;  %2448 = vmatprep.subr.bf16.mxu1 %v2621_v1  ;;  %v2605_v49 = vld [vmem:[%s3175_s7 + $0xa0] sm:$0xff]  }
 0x14f   : > { %2440 = vmatprep.mubr.msk.bf16.mxu0 %vm2622_vm0, %v2621_v1  ;;  %2425 = vmatpush3.bf16.msra.mxu0 %v2583_v51  ;;  %v2607_v51 = vld [vmem:[%s3175_s7 + $0x98] sm:$0xff]  }
 0x150   : > { %2426 = vmatprep.subr.bf16.mxu0 %v2621_v1 }
 0x151   : > { %2449 = vmatpush3.bf16.msra.mxu1 %v2584_v53 }
 0x152   : > { %2450 = vmatprep.subr.bf16.mxu1 %v2621_v1 }
 0x153   : > { %2427 = vmatpush3.bf16.msra.mxu0 %v2585_v54 }
 0x154   : > { %2428 = vmatprep.subr.bf16.mxu0 %v2621_v1 }
 0x155   : > { %2451 = vmatpush3.bf16.msra.mxu1 %v2586_v55  ;;  %v1727_v55 = vrot.slane %v2624_v40, 2 }
 0x156   : > { %2452 = vmatprep.subr.bf16.mxu1 %v2621_v1 }
 0x157   : > { %2429 = vmatpush3.bf16.msra.mxu0 %v2587_v56  ;;  %v2609_v56 = vld [vmem:[%s3175_s7 + $0x90] sm:$0xff]  }
 0x158   : > { %2430 = vmatprep.subr.bf16.mxu0 %v2621_v1 }
 0x159   : > { %2453 = vmatpush3.bf16.msra.mxu1 %v2588_v57  ;;  %v2610_v57 = vld [vmem:[%s3175_s7 + $0xc0] sm:$0xff]  }
 0x15a   : > { %2454 = vmatprep.subr.bf16.mxu1 %v2621_v1 }
 0x15b   : > { %2431 = vmatpush3.bf16.msra.mxu0 %v2589_v58 }
 0x15c   : > { %2432 = vmatprep.subr.bf16.mxu0 %v2621_v1 }
 0x15d   : > { %2455 = vmatpush3.bf16.msra.mxu1 %v2590_v59  ;;  %v1728_v59 = vor.u32 %v1727_v55, %v1407_v41 }
 0x15e   : > { %2456 = vmatprep.subr.bf16.mxu1 %v2621_v1 }
 0x15f   : > { %2433 = vmatpush3.bf16.msra.mxu0 %v2591_v60  ;;  %v2611_v60 = vld [vmem:[%s3175_s7 + $0x88] sm:$0xff]  }
 0x160   : > { %2434 = vmatprep.subr.bf16.mxu0 %v2621_v1 }
 0x161   : > { %2457 = vmatpush3.bf16.msra.mxu1 %v2592_v61 }
 0x162   : > { %2458 = vmatprep.subr.bf16.mxu1 %v2621_v1 }
 0x163   : > { %2435 = vmatpush3.bf16.msra.mxu0 %v2593_v62  ;;  %v2612_v62 = vld [vmem:[%s3175_s7 + $0x80] sm:$0xff]  }
 0x164   : > { %2436 = vmatprep.subr.bf16.mxu0 %v2621_v1 }
 0x165   : > { %2459 = vmatpush3.bf16.msra.mxu1 %v2594_v63 }
 0x166   : > { %2484 = vmatprep.subr.bf16.mxu1 %v2621_v1 }
 0x167   : > { %2437 = vmatpush3.bf16.msra.mxu0 %v2595_v0  ;;  %v2625_v0 = vmov 0.0|0.0  }
 0x168   : > { %2438 = vmatprep.subr.bf16.mxu0 %v2621_v1 }
 0x16b   : > { %2439 = vmatpush3.bf16.msra.mxu0 %v2597_v2  ;;  %v1609_v2 = vrot.slane %v2625_v0, 1 }
 0x16c   : > { %2464 = vmatprep.subr.bf16.mxu0 %v2621_v1 }
 0x1e7   : > { %v1114_v3 = vpop.f32.mrf.mxu1 }
 0x1e9   : > { %v2382_v4 = vpop.f32.mrf.mxu1 }
 0x1eb   : > { %v1117_v5 = vpop.f32.mrf.mxu1 }
 0x1ed   : > { %v2383_v6 = vpop.f32.mrf.mxu1 }
 0x1ee   : > { %v1025_v8 = vpop.f32.mrf.mxu0 }
 0x1ef   : > { %v1115_v15 = vadd.f32 %v1114_v3, %v1025_v8 }
 0x1f0   : > { %v2362_v9 = vpop.f32.mrf.mxu0 }
 0x1f2   : > { %v1028_v10 = vpop.f32.mrf.mxu0 }
 0x1f3   : > { %v1118_v21 = vadd.f32 %v1117_v5, %v1028_v10 }
 0x1f4   : > { %v2363_v11 = vpop.f32.mrf.mxu0 }
 0x207   : > { %v1335_v12 = vpop.f32.mrf.mxu1 }
 0x209   : > { %v2422_v13 = vpop.f32.mrf.mxu1 }
 0x20b   : > { %v1338_v14 = vpop.f32.mrf.mxu1 }
 0x20d   : > { %v2423_v16 = vpop.f32.mrf.mxu1 }
 0x20e   : > { %v1223_v17 = vpop.f32.mrf.mxu0 }
 0x20f   : > { %v1230_v18 = vadd.f32 %v1223_v17, %v1115_v15 }
 0x210   : > { %v2402_v20 = vpop.f32.mrf.mxu0 }
 0x211   : > { %v1342_v22 = vadd.f32 %v1335_v12, %v1230_v18 }
 0x212   : > { %v1226_v23 = vpop.f32.mrf.mxu0 }
 0x213   : > { %v1351_v24 = vadd.f32 %v2067_v19, %v1342_v22  ;;  %v1231_v25 = vadd.f32 %v1226_v23, %v1118_v21 }
 0x214   : > { %v2403_v26 = vpop.f32.mrf.mxu0 }
 0x215   : > { %v1343_v27 = vadd.f32 %v1338_v14, %v1231_v25  ;;  %v1355_v28 = vrot.slane %v1351_v24, 5 }
 0x217   : > { %v1352_v29 = vadd.f32 %v2067_v19, %v1343_v27  ;;  %v1360_v31 = vsel %vm430_vm9, 0.0, %v1355_v28  ;;  %v2152_v19 = vld [vmem:[%s3176_s8] ss:$0 sm:$0xff] }
 0x219   : > { %v1356_v30 = vrot.slane %v1352_v29, 5 }
 0x21b   : > { %v1357_v32 = vsel %vm430_vm9, %v1355_v28, %v1356_v30  ;;  %vm1607_vm9 = vcmask 1046528  }
 0x21c   : > { %v3090_v34 = vpack.c.bf16 %v1357_v32, %v1360_v31  ;;  %v2102_v35 = vpack.c.bf16 %v1357_v32, %v1355_v28 }
 0x21e   : > { %2461 = vmatmul.mubr.msk.bf16.vlgmr.msra.gmra.mxu1 %vm2101_vm7, %v2102_v35  ;;  %v1400_v36 = vshll.u32 %v3090_v34, 16  ;;  %v1398_v7 = vshrl.u32 %v3090_v34, 16  ;;  %v1608_v63 = vrot.slane %v3090_v34, 1 }
 0x21f   : > { %2485 = vmatpush3.bf16.msra.mxu1 %v2596_v33  ;;  %2500 = vmatprep.mubr.msk.bf16.mxu1 %vm2622_vm0, %v2621_v1 }
 0x220   : > { %2486 = vmatprep.subr.bf16.mxu1 %v2621_v1  ;;  %v1402_v38 = vrot.slane %v1400_v36, 1  ;;  %v1721_v53 = vrot.slane %v1398_v7, 1  ;;  %v1722_v54 = vrot.slane %v1400_v36, 2  ;;  %v1610_v3 = vsel %vm1607_vm9, %v1608_v63, %v1609_v2 }
 0x222   : > { %v1403_v39 = vor.u32 %v1402_v38, %v1398_v7  ;;  %v1723_v58 = vor.u32 %v1722_v54, %v1721_v53 }
 0x223   : > { %2487 = vmatpush3.bf16.msra.mxu1 %v2598_v37 }
 0x224   : > { %v1408_v44 = vsel %vm1396_vm8, %v1403_v39, %v1407_v41  ;;  %2488 = vmatprep.subr.bf16.mxu1 %v2621_v1 }
 0x225   : > { %2441 = vmatmul.mubr.bf16.vlgmr.msra.gmra.mxu0 %v1408_v44 }
 0x226   : > { %2465 = vmatpush3.bf16.msra.mxu0 %v2599_v42  ;;  %2480 = vmatprep.mubr.msk.bf16.mxu0 %vm2622_vm0, %v2621_v1  ;;  %vm1720_vm0 = vsmask.f32 6400 }
 0x227   : > { %2489 = vmatpush3.bf16.msra.mxu1 %v2600_v43  ;;  %2466 = vmatprep.subr.bf16.mxu0 %v2621_v1  ;;  %v1729_v61 = vsel %vm1720_vm0, %v1723_v58, %v1728_v59 }
 0x228   : > { %2490 = vmatprep.subr.bf16.mxu1 %v2621_v1 }
 0x22a   : > { %2467 = vmatpush3.bf16.msra.mxu0 %v2601_v45 }
 0x22b   : > { %2491 = vmatpush3.bf16.msra.mxu1 %v2602_v46  ;;  %2468 = vmatprep.subr.bf16.mxu0 %v2621_v1 }
 0x22c   : > { %2492 = vmatprep.subr.bf16.mxu1 %v2621_v1 }
 0x22e   : > { %2469 = vmatpush3.bf16.msra.mxu0 %v2603_v47 }
 0x22f   : > { %2493 = vmatpush3.bf16.msra.mxu1 %v2604_v48  ;;  %2470 = vmatprep.subr.bf16.mxu0 %v2621_v1 }
 0x230   : > { %2494 = vmatprep.subr.bf16.mxu1 %v2621_v1 }
 0x232   : > { %2471 = vmatpush3.bf16.msra.mxu0 %v2605_v49 }
 0x233   : > { %2495 = vmatpush3.bf16.msra.mxu1 %v2606_v50  ;;  %2472 = vmatprep.subr.bf16.mxu0 %v2621_v1 }
 0x234   : > { %2496 = vmatprep.subr.bf16.mxu1 %v2621_v1 }
 0x236   : > { %2473 = vmatpush3.bf16.msra.mxu0 %v2607_v51 }
 0x237   : > { %2497 = vmatpush3.bf16.msra.mxu1 %v2608_v52  ;;  %2474 = vmatprep.subr.bf16.mxu0 %v2621_v1 }
 0x238   : > { %2498 = vmatprep.subr.bf16.mxu1 %v2621_v1 }
 0x23a   : > { %2475 = vmatpush3.bf16.msra.mxu0 %v2609_v56 }
 0x23b   : > { %2499 = vmatpush3.bf16.msra.mxu1 %v2610_v57  ;;  %2476 = vmatprep.subr.bf16.mxu0 %v2621_v1 }
 0x23e   : > { %2477 = vmatpush3.bf16.msra.mxu0 %v2611_v60  ;;  %2501 = vmatmul.mubr.bf16.vlgmr.msra.gmra.mxu1 %v1729_v61 }
 0x23f   : > { %2478 = vmatprep.subr.bf16.mxu0 %v2621_v1 }
 0x242   : > { %2479 = vmatpush3.bf16.msra.mxu0 %v2612_v62 }
 0x245   : > { %2481 = vmatmul.mubr.bf16.vlgmr.msra.gmra.mxu0 %v1610_v3 }
 0x2de   : > { %v1581_v4 = vpop.f32.mrf.mxu1 }
 0x2e0   : > { %v2462_v5 = vpop.f32.mrf.mxu1 }
 0x2e2   : > { %v1584_v6 = vpop.f32.mrf.mxu1 }
 0x2e4   : > { %v2463_v8 = vpop.f32.mrf.mxu1 }
 0x2e5   : > { %v1492_v9 = vpop.f32.mrf.mxu0 }
 0x2e6   : > { %v1582_v15 = vadd.f32 %v1581_v4, %v1492_v9 }
 0x2e7   : > { %v2442_v10 = vpop.f32.mrf.mxu0 }
 0x2e9   : > { %v1495_v11 = vpop.f32.mrf.mxu0 }
 0x2ea   : > { %v1585_v21 = vadd.f32 %v1584_v6, %v1495_v11 }
 0x2eb   : > { %v2443_v12 = vpop.f32.mrf.mxu0 }
 0x2fe   : > { %v1813_v13 = vpop.f32.mrf.mxu1 }
 0x300   : > { %v2502_v14 = vpop.f32.mrf.mxu1 }
 0x302   : > { %v1816_v1 = vpop.f32.mrf.mxu1 }
 0x304   : > { %v2503_v16 = vpop.f32.mrf.mxu1 }
 0x305   : > { %v1694_v17 = vpop.f32.mrf.mxu0 }
 0x306   : > { %v1701_v18 = vadd.f32 %v1694_v17, %v1582_v15 }
 0x307   : > { %v2482_v20 = vpop.f32.mrf.mxu0 }
 0x308   : > { %v1820_v22 = vadd.f32 %v1813_v13, %v1701_v18 }
 0x309   : > { %v1697_v23 = vpop.f32.mrf.mxu0 }
 0x30a   : > { %v1829_v24 = vadd.f32 %v2152_v19, %v1820_v22  ;;  %v1702_v25 = vadd.f32 %v1697_v23, %v1585_v21 }
 0x30b   : > { %v2483_v26 = vpop.f32.mrf.mxu0 }
 0x30c   : > { %1831 = vst [vmem:[%s329_s11] sm:$0xff] %v1829_v24  ;;  %v1821_v27 = vadd.f32 %v1816_v1, %v1702_v25 }
 0x30e   : > { %v1830_v28 = vadd.f32 %v2152_v19, %v1821_v27 }
 0x310   : > { %1832 = vst [vmem:[%s329_s11 + $0x8] sm:$0xff] %v1830_v28 }
 0x311 PF: > { %s19_s30 = sadd.s32 1, %s2619_s30  }
 0x312   : > { %p16_p4 = scmp.ge.s32.totalorder %s19_s30, 4  }
 0x314   :  { %18 = sbr.rel (!%p16_p4) target bundleno = 1 (0x1), region = 95 }

</bundles_post_ra>
